<compile_context>
chip_gen: v7x
topology: tpu7x:2x2x1
jax: 0.10.0
libtpu: 0.0.40
codegen_flags: <defaults>
</compile_context>

<pallas_src>
import jax
import jax.numpy as jnp
from jax.experimental import pallas as pl
from jax.experimental.pallas import tpu as pltpu


def _round_up(x, m):
    return ((x + m - 1) // m) * m


def _vector_attn_kernel(center_ref, nbr_ref, pos_ref,
                        wq_ref, wkv_ref, w1_ref, w2_ref,
                        bn_scale_ref, bn_shift_ref,
                        out_ref):
    _, tn, M, C = nbr_ref.shape

    center = center_ref[0].astype(jnp.bfloat16)                   # (tn, C)
    nbr = nbr_ref[0].reshape(tn * M, C).astype(jnp.bfloat16)      # (tn*M, C)
    pos = pos_ref[0].astype(jnp.float32)                          # (tn, M, C)

    # Q = center @ Wq^T ; fused [K|V] = nbr @ [Wk|Wv]^T  (single MXU pass over nbr)
    q = jnp.dot(center, wq_ref[...], preferred_element_type=jnp.float32)   # (tn, C)
    kv = jnp.dot(nbr, wkv_ref[...], preferred_element_type=jnp.float32)    # (tn*M, 2C)
    k = kv[:, :C].reshape(tn, M, C)
    v = kv[:, C:].reshape(tn, M, C)

    # attention logits: Q.unsqueeze(2) - K + pos_enc
    a = (q.reshape(tn, 1, C) - k + pos).reshape(tn * M, C).astype(jnp.bfloat16)

    # mlp: 1x1 conv -> BatchNorm (inference, folded) -> ReLU -> 1x1 conv
    h = jnp.dot(a, w1_ref[...], preferred_element_type=jnp.float32)        # (tn*M, dh)
    h = h * bn_scale_ref[...] + bn_shift_ref[...]
    h = jnp.maximum(h, 0.0).astype(jnp.bfloat16)
    attn = jnp.dot(h, w2_ref[...], preferred_element_type=jnp.float32)     # (tn*M, C)
    attn = attn.reshape(tn, M, C)

    # softmax over the neighbor axis M, with the normalization fused after the
    # reduction:  out = (sum_M exp(attn - m) * (V + pos)) / (sum_M exp(attn - m))
    m = jnp.max(attn, axis=1, keepdims=True)
    e = jnp.exp(attn - m)
    s = jnp.sum(e, axis=1)                                        # (tn, C)
    num = jnp.sum(e * (v + pos), axis=1)                          # (tn, C)
    out_ref[0] = (num * pl.reciprocal(s, approx=True)).astype(out_ref.dtype)


def _vmem_capacity_bytes():
    try:
        cap = getattr(pltpu.get_tpu_info(), "vmem_capacity_bytes", None)
        if cap:
            return int(cap)
    except Exception:
        pass
    return 64 * 2**20   # conservative fallback: v7x physical VMEM per TensorCore


def _vmem_bytes_estimate(tn, M, C, dh):
    # double-buffered f32 in/out blocks + generous bound on in-kernel temporaries
    blocks = 2 * 4 * (2 * tn * C + 2 * tn * M * C)
    temps = tn * M * (26 * C + 7 * dh)
    weights = 2 * (3 * C * C + 2 * C * dh) + 8 * dh
    return blocks + temps + weights + (2 << 20)


def vector_attention_v3(center_feat, neighbor_feat, pos_enc, params, *, tn=None):
    """Forward pass of VectorAttentionLayerV3 (inference-mode BatchNorm)."""
    B, N, C = center_feat.shape
    M = neighbor_feat.shape[2]
    dh = params["w1"].shape[0]

    # --- per-generation VMEM budget and N-tile selection ---
    vmem_budget = min(96 * 2**20, int(0.75 * _vmem_capacity_bytes()))
    if tn is None:
        tn = 512 if vmem_budget >= 72 * 2**20 else 256   # bigger tiles on 128-MiB parts
    tn = max(16, min(_round_up(int(tn), 16), _round_up(N, 16)))
    while tn > 16 and _vmem_bytes_estimate(tn, M, C, dh) > vmem_budget:
        tn = max(16, _round_up(tn // 2, 16))
    n_tiles = pl.cdiv(N, tn)

    # Tiny pre-transposed (contraction-major) bf16 weights. The heavy (B, N, M, C)
    # activations are passed unpadded / uncast: the kernel reads exactly 4 B/element.
    wq_t = jnp.asarray(params["wq"], jnp.float32).T.astype(jnp.bfloat16)     # (C, C)
    wkv_t = jnp.asarray(params["wkv"], jnp.float32).T.astype(jnp.bfloat16)   # (C, 2C)
    w1_t = jnp.asarray(params["w1"], jnp.float32).T.astype(jnp.bfloat16)     # (C, dh)
    w2_t = jnp.asarray(params["w2"], jnp.float32).T.astype(jnp.bfloat16)     # (dh, C)
    bn_scale = jnp.asarray(params["bn_scale"], jnp.float32).reshape(1, dh)
    bn_shift = jnp.asarray(params["bn_shift"], jnp.float32).reshape(1, dh)

    # advisory cost estimate for the surrounding XLA schedule
    flops = int(2 * B * N * C * C + 4 * B * N * M * C * C
                + 4 * B * N * M * C * dh + 12 * B * N * M * C)
    transcendentals = int(B * N * M * C + B * N * C)
    bytes_accessed = int(4 * (center_feat.size + neighbor_feat.size + pos_enc.size
                              + B * N * C)
                         + 2 * (wq_t.size + wkv_t.size + w1_t.size + w2_t.size)
                         + 4 * (bn_scale.size + bn_shift.size))

    wmap = lambda n, b: (0, 0)
    out = pl.pallas_call(
        _vector_attn_kernel,
        out_shape=jax.ShapeDtypeStruct((B, N, C), center_feat.dtype),
        grid_spec=pltpu.PrefetchScalarGridSpec(
            num_scalar_prefetch=0,
            # N-tile axis first so megacore (v7x, 2 TCs) can shard it when B is tiny.
            grid=(n_tiles, B),
            in_specs=[
                pl.BlockSpec((1, tn, C), lambda n, b: (b, n, 0)),
                pl.BlockSpec((1, tn, M, C), lambda n, b: (b, n, 0, 0)),
                pl.BlockSpec((1, tn, M, C), lambda n, b: (b, n, 0, 0)),
                pl.BlockSpec((C, C), wmap),
                pl.BlockSpec((C, 2 * C), wmap),
                pl.BlockSpec((C, dh), wmap),
                pl.BlockSpec((dh, C), wmap),
                pl.BlockSpec((1, dh), wmap),
                pl.BlockSpec((1, dh), wmap),
            ],
            out_specs=pl.BlockSpec((1, tn, C), lambda n, b: (b, n, 0)),
        ),
        compiler_params=pltpu.CompilerParams(
            dimension_semantics=("parallel", "parallel"),
            vmem_limit_bytes=int(vmem_budget)),
        cost_estimate=pl.CostEstimate(flops=flops,
                                      transcendentals=transcendentals,
                                      bytes_accessed=bytes_accessed),
    )(center_feat, neighbor_feat, pos_enc,
      wq_t, wkv_t, w1_t, w2_t, bn_scale, bn_shift)
    return out


# ----------------------------- references for validation -----------------------------

def _reference_f32(center, nbr, pos, p):
    """Pure f32 reference matching the PyTorch module semantics."""
    C = center.shape[-1]
    q = center @ p["wq"].T
    kv = nbr @ p["wkv"].T
    k, v = kv[..., :C], kv[..., C:]
    a = q[:, :, None, :] - k + pos
    h = jnp.maximum(a @ p["w1"].T * p["bn_scale"] + p["bn_shift"], 0.0)
    attn = h @ p["w2"].T
    sm = jax.nn.softmax(attn, axis=2)
    return jnp.sum(sm * (v + pos), axis=2)


def _reference_matched(center, nbr, pos, p):
    """Mirrors the kernel's bf16-operand / f32-accumulate precision choices."""
    C = center.shape[-1]
    bf = jnp.bfloat16

    def dot(x, w_t):
        xf = x.astype(bf).reshape(-1, x.shape[-1])
        y = jax.lax.dot_general(xf, jnp.asarray(w_t, jnp.float32).astype(bf),
                                (((1,), (0,)), ((), ())),
                                preferred_element_type=jnp.float32)
        return y.reshape(x.shape[:-1] + (w_t.shape[-1],))

    q = dot(center, p["wq"].T)
    kv = dot(nbr, p["wkv"].T)
    k, v = kv[..., :C], kv[..., C:]
    a = q[:, :, None, :] - k + pos
    h = jnp.maximum(dot(a, p["w1"].T) * p["bn_scale"] + p["bn_shift"], 0.0)
    attn = dot(h, p["w2"].T)
    sm = jax.nn.softmax(attn, axis=2)
    return jnp.sum(sm * (v + pos), axis=2)


if __name__ == "__main__":
    B, N, M = 2, 16, 8
    d = 32                     # channel dim C
    hidden_scale = 2.0
    dh = int(d * hidden_scale)

    key = jax.random.PRNGKey(0)
    keys = jax.random.split(key, 10)

    # deterministic "parameters" (no checkpoint load)
    wq = 0.1 * jax.random.normal(keys[0], (d, d), jnp.float32)        # nn.Linear(d, d)
    wkv = 0.1 * jax.random.normal(keys[1], (2 * d, d), jnp.float32)   # nn.Linear(d, 2d)
    w1 = 0.1 * jax.random.normal(keys[2], (dh, d), jnp.float32)       # Conv2d(d, dh, 1)
    w2 = 0.1 * jax.random.normal(keys[3], (d, dh), jnp.float32)       # Conv2d(dh, d, 1)
    gamma = 1.0 + 0.1 * jax.random.normal(keys[4], (dh,), jnp.float32)
    beta = 0.1 * jax.random.normal(keys[5], (dh,), jnp.float32)
    run_mean = 0.1 * jax.random.normal(keys[6], (dh,), jnp.float32)
    run_var = jnp.abs(jax.random.normal(keys[7], (dh,), jnp.float32)) + 0.5
    eps = 1e-5
    bn_scale = (gamma / jnp.sqrt(run_var + eps)).reshape(1, dh)
    bn_shift = (beta - run_mean * gamma / jnp.sqrt(run_var + eps)).reshape(1, dh)

    params = dict(wq=wq, wkv=wkv, w1=w1, w2=w2,
                  bn_scale=bn_scale, bn_shift=bn_shift)

    center_feat = jax.random.normal(keys[8], (B, N, d), jnp.float32)
    nbr_pos = jax.random.normal(keys[9], (B, N, M, 2 * d), jnp.float32)
    neighbor_feat = nbr_pos[..., :d]
    pos_enc = nbr_pos[..., d:]

    out = vector_attention_v3(center_feat, neighbor_feat, pos_enc, params)
    out = jax.block_until_ready(out)
    assert out.shape == (B, N, d)

    ref_bf = _reference_matched(center_feat, neighbor_feat, pos_enc, params)
    ref_32 = _reference_f32(center_feat, neighbor_feat, pos_enc, params)

    # tight check against a precision-matched reference (validates the kernel math)
    assert jnp.allclose(out, ref_bf, rtol=1e-2, atol=1e-2), \
        float(jnp.max(jnp.abs(out - ref_bf)))
    # loose check against the pure-f32 (PyTorch-semantics) reference
    assert jnp.allclose(out, ref_32, rtol=5e-2, atol=5e-2), \
        float(jnp.max(jnp.abs(out - ref_32)))

    print("KERNEL_OK")
</pallas_src>

<mosaic_0001>
module attributes {stable_mosaic.version = 11 : i64} {
  func.func @_vector_attn_kernel(%arg0: i32, %arg1: i32, %arg2: memref<1x16x32xf32, #tpu.memory_space<vmem>>, %arg3: memref<1x16x8x32xf32, #tpu.memory_space<vmem>>, %arg4: memref<1x16x8x32xf32, #tpu.memory_space<vmem>>, %arg5: memref<32x32xbf16, #tpu.memory_space<vmem>>, %arg6: memref<32x64xbf16, #tpu.memory_space<vmem>>, %arg7: memref<32x64xbf16, #tpu.memory_space<vmem>>, %arg8: memref<64x32xbf16, #tpu.memory_space<vmem>>, %arg9: memref<1x64xf32, #tpu.memory_space<vmem>>, %arg10: memref<1x64xf32, #tpu.memory_space<vmem>>, %arg11: memref<1x16x32xf32, #tpu.memory_space<vmem>>) attributes {dimension_semantics = [#tpu.dimension_semantics<parallel>, #tpu.dimension_semantics<parallel>], iteration_bounds = array<i64: 1, 2>, scalar_prefetch = 0 : i64, scratch_operands = 0 : i64, tpu.core_type = #tpu.core_type<tc>, window_params = [{transform_indices = @transform_0, window_bounds = array<i64: 1, 16, 32>}, {transform_indices = @transform_1, window_bounds = array<i64: 1, 16, 8, 32>}, {transform_indices = @transform_2, window_bounds = array<i64: 1, 16, 8, 32>}, {pipeline_mode = #tpu.pipeline_mode<synchronous>, transform_indices = @transform_3, window_bounds = array<i64: 32, 32>}, {pipeline_mode = #tpu.pipeline_mode<synchronous>, transform_indices = @transform_4, window_bounds = array<i64: 32, 64>}, {pipeline_mode = #tpu.pipeline_mode<synchronous>, transform_indices = @transform_5, window_bounds = array<i64: 32, 64>}, {pipeline_mode = #tpu.pipeline_mode<synchronous>, transform_indices = @transform_6, window_bounds = array<i64: 64, 32>}, {pipeline_mode = #tpu.pipeline_mode<synchronous>, transform_indices = @transform_7, window_bounds = array<i64: 1, 64>}, {pipeline_mode = #tpu.pipeline_mode<synchronous>, transform_indices = @transform_8, window_bounds = array<i64: 1, 64>}, {transform_indices = @transform_9, window_bounds = array<i64: 1, 16, 32>}]} {
    %c0 = arith.constant 0 : index
    %c0_0 = arith.constant 0 : index
    %c0_1 = arith.constant 0 : index
    %0 = vector.load %arg2[%c0, %c0_0, %c0_1] : memref<1x16x32xf32, #tpu.memory_space<vmem>>, vector<1x16x32xf32>
    %1 = vector.shape_cast %0 : vector<1x16x32xf32> to vector<16x32xf32>
    %2 = arith.truncf %1 : vector<16x32xf32> to vector<16x32xbf16>
    %c0_2 = arith.constant 0 : index
    %c0_3 = arith.constant 0 : index
    %c0_4 = arith.constant 0 : index
    %c0_5 = arith.constant 0 : index
    %3 = vector.load %arg3[%c0_2, %c0_3, %c0_4, %c0_5] : memref<1x16x8x32xf32, #tpu.memory_space<vmem>>, vector<1x16x8x32xf32>
    %4 = vector.shape_cast %3 : vector<1x16x8x32xf32> to vector<16x8x32xf32>
    %5 = vector.shape_cast %4 : vector<16x8x32xf32> to vector<128x32xf32>
    %6 = arith.truncf %5 : vector<128x32xf32> to vector<128x32xbf16>
    %c0_6 = arith.constant 0 : index
    %c0_7 = arith.constant 0 : index
    %c0_8 = arith.constant 0 : index
    %c0_9 = arith.constant 0 : index
    %7 = vector.load %arg4[%c0_6, %c0_7, %c0_8, %c0_9] : memref<1x16x8x32xf32, #tpu.memory_space<vmem>>, vector<1x16x8x32xf32>
    %8 = vector.shape_cast %7 : vector<1x16x8x32xf32> to vector<16x8x32xf32>
    %c0_10 = arith.constant 0 : index
    %c0_11 = arith.constant 0 : index
    %9 = vector.load %arg5[%c0_10, %c0_11] : memref<32x32xbf16, #tpu.memory_space<vmem>>, vector<32x32xbf16>
    %cst = arith.constant dense<0.000000e+00> : vector<16x32xf32>
    %10 = tpu.matmul %2, %9, %cst {dimension_numbers = #tpu.dot_dimension_numbers<[1], [0], [0], [1], [0, 0, 1, 1], [], []>} : vector<16x32xbf16>, vector<32x32xbf16>, vector<16x32xf32> -> vector<16x32xf32>
    %c0_12 = arith.constant 0 : index
    %c0_13 = arith.constant 0 : index
    %11 = vector.load %arg6[%c0_12, %c0_13] : memref<32x64xbf16, #tpu.memory_space<vmem>>, vector<32x64xbf16>
    %cst_14 = arith.constant dense<0.000000e+00> : vector<128x64xf32>
    %12 = tpu.matmul %6, %11, %cst_14 {dimension_numbers = #tpu.dot_dimension_numbers<[1], [0], [0], [1], [0, 0, 1, 1], [], []>} : vector<128x32xbf16>, vector<32x64xbf16>, vector<128x64xf32> -> vector<128x64xf32>
    %13 = vector.extract_strided_slice %12 {offsets = [0, 0], sizes = [128, 32], strides = [1, 1]} : vector<128x64xf32> to vector<128x32xf32>
    %14 = vector.shape_cast %13 : vector<128x32xf32> to vector<16x8x32xf32>
    %15 = vector.extract_strided_slice %12 {offsets = [0, 32], sizes = [128, 32], strides = [1, 1]} : vector<128x64xf32> to vector<128x32xf32>
    %16 = vector.shape_cast %15 : vector<128x32xf32> to vector<16x8x32xf32>
    %17 = vector.shape_cast %10 : vector<16x32xf32> to vector<16x1x32xf32>
    %18 = vector.broadcast %17 : vector<16x1x32xf32> to vector<16x8x32xf32>
    %19 = arith.subf %18, %14 : vector<16x8x32xf32>
    %20 = arith.addf %19, %8 : vector<16x8x32xf32>
    %21 = vector.shape_cast %20 : vector<16x8x32xf32> to vector<128x32xf32>
    %22 = arith.truncf %21 : vector<128x32xf32> to vector<128x32xbf16>
    %c0_15 = arith.constant 0 : index
    %c0_16 = arith.constant 0 : index
    %23 = vector.load %arg7[%c0_15, %c0_16] : memref<32x64xbf16, #tpu.memory_space<vmem>>, vector<32x64xbf16>
    %cst_17 = arith.constant dense<0.000000e+00> : vector<128x64xf32>
    %24 = tpu.matmul %22, %23, %cst_17 {dimension_numbers = #tpu.dot_dimension_numbers<[1], [0], [0], [1], [0, 0, 1, 1], [], []>} : vector<128x32xbf16>, vector<32x64xbf16>, vector<128x64xf32> -> vector<128x64xf32>
    %c0_18 = arith.constant 0 : index
    %c0_19 = arith.constant 0 : index
    %25 = vector.load %arg9[%c0_18, %c0_19] : memref<1x64xf32, #tpu.memory_space<vmem>>, vector<1x64xf32>
    %26 = vector.broadcast %25 : vector<1x64xf32> to vector<128x64xf32>
    %27 = arith.mulf %24, %26 : vector<128x64xf32>
    %c0_20 = arith.constant 0 : index
    %c0_21 = arith.constant 0 : index
    %28 = vector.load %arg10[%c0_20, %c0_21] : memref<1x64xf32, #tpu.memory_space<vmem>>, vector<1x64xf32>
    %29 = vector.broadcast %28 : vector<1x64xf32> to vector<128x64xf32>
    %30 = arith.addf %27, %29 : vector<128x64xf32>
    %cst_22 = arith.constant 0.000000e+00 : f32
    %31 = vector.broadcast %cst_22 : f32 to vector<128x64xf32>
    %32 = arith.maximumf %30, %31 : vector<128x64xf32>
    %33 = arith.truncf %32 : vector<128x64xf32> to vector<128x64xbf16>
    %c0_23 = arith.constant 0 : index
    %c0_24 = arith.constant 0 : index
    %34 = vector.load %arg8[%c0_23, %c0_24] : memref<64x32xbf16, #tpu.memory_space<vmem>>, vector<64x32xbf16>
    %cst_25 = arith.constant dense<0.000000e+00> : vector<128x32xf32>
    %35 = tpu.matmul %33, %34, %cst_25 {dimension_numbers = #tpu.dot_dimension_numbers<[1], [0], [0], [1], [0, 0, 1, 1], [], []>} : vector<128x64xbf16>, vector<64x32xbf16>, vector<128x32xf32> -> vector<128x32xf32>
    %36 = vector.shape_cast %35 : vector<128x32xf32> to vector<16x8x32xf32>
    %cst_26 = arith.constant dense<0xFF800000> : vector<16x32xf32>
    %37 = vector.multi_reduction <maximumf>, %36, %cst_26 [1] : vector<16x8x32xf32> to vector<16x32xf32>
    %38 = vector.shape_cast %37 : vector<16x32xf32> to vector<16x1x32xf32>
    %39 = vector.broadcast %38 : vector<16x1x32xf32> to vector<16x8x32xf32>
    %40 = arith.subf %36, %39 : vector<16x8x32xf32>
    %41 = math.exp %40 : vector<16x8x32xf32>
    %cst_27 = arith.constant dense<0.000000e+00> : vector<16x32xf32>
    %42 = vector.multi_reduction <add>, %41, %cst_27 [1] : vector<16x8x32xf32> to vector<16x32xf32>
    %43 = arith.addf %16, %8 : vector<16x8x32xf32>
    %44 = arith.mulf %41, %43 : vector<16x8x32xf32>
    %cst_28 = arith.constant dense<0.000000e+00> : vector<16x32xf32>
    %45 = vector.multi_reduction <add>, %44, %cst_28 [1] : vector<16x8x32xf32> to vector<16x32xf32>
    %46 = tpu.reciprocal %42 {approx = true} : vector<16x32xf32> -> vector<16x32xf32>
    %47 = arith.mulf %45, %46 : vector<16x32xf32>
    %c0_29 = arith.constant 0 : index
    %c0_30 = arith.constant 0 : index
    %c0_31 = arith.constant 0 : index
    %48 = vector.load %arg11[%c0_29, %c0_30, %c0_31] : memref<1x16x32xf32, #tpu.memory_space<vmem>>, vector<1x16x32xf32>
    %49 = vector.shape_cast %48 : vector<1x16x32xf32> to vector<16x32xf32>
    %50 = vector.shape_cast %47 : vector<16x32xf32> to vector<1x16x32xf32>
    tpu.vector_store %arg11[%c0_29, %c0_30, %c0_31], %50 {strides = array<i32>} : memref<1x16x32xf32, #tpu.memory_space<vmem>>, vector<1x16x32xf32>,
    return
  }
  func.func @transform_0(%arg0: i32, %arg1: i32) -> (i32, i32, i32) {
    %c0_i32 = arith.constant 0 : i32
    %c0_i32_0 = arith.constant 0 : i32
    return %arg1, %arg0, %c0_i32 : i32, i32, i32
  }
  func.func @transform_1(%arg0: i32, %arg1: i32) -> (i32, i32, i32, i32) {
    %c0_i32 = arith.constant 0 : i32
    %c0_i32_0 = arith.constant 0 : i32
    %c0_i32_1 = arith.constant 0 : i32
    return %arg1, %arg0, %c0_i32, %c0_i32_0 : i32, i32, i32, i32
  }
  func.func @transform_2(%arg0: i32, %arg1: i32) -> (i32, i32, i32, i32) {
    %c0_i32 = arith.constant 0 : i32
    %c0_i32_0 = arith.constant 0 : i32
    %c0_i32_1 = arith.constant 0 : i32
    return %arg1, %arg0, %c0_i32, %c0_i32_0 : i32, i32, i32, i32
  }
  func.func @transform_3(%arg0: i32, %arg1: i32) -> (i32, i32) {
    %c0_i32 = arith.constant 0 : i32
    %c0_i32_0 = arith.constant 0 : i32
    %c0_i32_1 = arith.constant 0 : i32
    return %c0_i32, %c0_i32_0 : i32, i32
  }
  func.func @transform_4(%arg0: i32, %arg1: i32) -> (i32, i32) {
    %c0_i32 = arith.constant 0 : i32
    %c0_i32_0 = arith.constant 0 : i32
    %c0_i32_1 = arith.constant 0 : i32
    return %c0_i32, %c0_i32_0 : i32, i32
  }
  func.func @transform_5(%arg0: i32, %arg1: i32) -> (i32, i32) {
    %c0_i32 = arith.constant 0 : i32
    %c0_i32_0 = arith.constant 0 : i32
    %c0_i32_1 = arith.constant 0 : i32
    return %c0_i32, %c0_i32_0 : i32, i32
  }
  func.func @transform_6(%arg0: i32, %arg1: i32) -> (i32, i32) {
    %c0_i32 = arith.constant 0 : i32
    %c0_i32_0 = arith.constant 0 : i32
    %c0_i32_1 = arith.constant 0 : i32
    return %c0_i32, %c0_i32_0 : i32, i32
  }
  func.func @transform_7(%arg0: i32, %arg1: i32) -> (i32, i32) {
    %c0_i32 = arith.constant 0 : i32
    %c0_i32_0 = arith.constant 0 : i32
    %c0_i32_1 = arith.constant 0 : i32
    return %c0_i32, %c0_i32_0 : i32, i32
  }
  func.func @transform_8(%arg0: i32, %arg1: i32) -> (i32, i32) {
    %c0_i32 = arith.constant 0 : i32
    %c0_i32_0 = arith.constant 0 : i32
    %c0_i32_1 = arith.constant 0 : i32
    return %c0_i32, %c0_i32_0 : i32, i32
  }
  func.func @transform_9(%arg0: i32, %arg1: i32) -> (i32, i32, i32) {
    %c0_i32 = arith.constant 0 : i32
    %c0_i32_0 = arith.constant 0 : i32
    return %arg1, %arg0, %c0_i32 : i32, i32, i32
  }
}

</mosaic_0001>

<bundles_post_ra>
// kernel: tpu_custom_call.1
= control target key start
LH: loop header
LB: loop body
LE: loop exit
PB: predicated region body
PF: predicated region fallthrough
CT: control target
= control target key end

     0   :  { %s3513_s0 = inlined_call_operand.vmem [shape: f32[2,16,32], index: 0, kind: input, shape index: {}]   ;;  %s3514_s1 = inlined_call_operand.hbm [shape: f32[2,16,8,32], index: 1, kind: input, shape index: {}]   ;;  %s3515_s2 = inlined_call_operand.hbm [shape: f32[2,16,8,32], index: 2, kind: input, shape index: {}]   ;;  %s3516_s3 = inlined_call_operand.vmem [shape: bf16[32,32], index: 3, kind: input, shape index: {}]   ;;  %s3517_s4 = inlined_call_operand.hbm [shape: bf16[32,64], index: 4, kind: input, shape index: {}]   ;;  %s3518_s5 = inlined_call_operand.hbm [shape: bf16[32,64], index: 5, kind: input, shape index: {}]   ;;  %s3519_s6 = inlined_call_operand.vmem [shape: bf16[64,32], index: 6, kind: input, shape index: {}]   ;;  %s3520_s7 = inlined_call_operand.vmem [shape: f32[1,64], index: 7, kind: input, shape index: {}]   ;;  %s3521_s8 = inlined_call_operand.vmem [shape: f32[1,64], index: 8, kind: input, shape index: {}]   ;;  %s3522_s9 = inlined_call_operand.hbm [shape: f32[2,16,32], index: 9, kind: output, shape index: {}]  }
   0x1   :  { %3531 = sst [smem:[#allocation20_spill]] %s3514_s1 }
   0x2   :  { %3532 = sst [smem:[#allocation21_spill]] %s3517_s4 }
   0x3   :  { %3533 = sst [smem:[#allocation22_spill]] %s3518_s5 }
   0x4   :  { %3534 = sst [smem:[#allocation23_spill]] %s3522_s9 }
   0x5   :  { %14 = vsyncpa [#allocation3], 0 }
   0x6   :  { %16 = vsyncpa [#allocation3 + $0x1], 0 }
   0x7   :  { %17 = vsyncpa [#allocation6], 0 }
   0x8   :  { %19 = vsyncpa [#allocation6 + $0x1], 0 }
   0x9   :  { %20 = vsyncpa [#allocation9], 0 }
   0xa   :  { %21 = vsyncpa [#allocation4], 0 }
   0xb   :  { %23 = vsyncpa [#allocation4 + $0x1], 0  ;;  %s2715_s30 = smov 0   ;;  %s2717_s10 = smov 0  }
   0xc   :  { %s2719_s11 = smov 0   ;;  %s2721_s12 = smov 0  }
   0xd   :  { %s2723_s13 = smov 0   ;;  %s2725_s14 = smov 0  }
   0xe LB: > { %3535 = sst [smem:[#allocation16_spill]] %s2627_s30  ;;  %s2746_s15 = sadd.s32 4294967295, %s2647_s14   ;;  %s2647_s14 = sphi %s2725_s14, %s29_s14   ;;  %s2643_s13 = sphi %s2723_s13, %s3567_s13   ;;  %s2639_s12 = sphi %s2721_s12, %s3566_s12   ;;  %s2635_s11 = sphi %s2719_s11, %s3565_s11   ;;  %s2631_s10 = sphi %s2717_s10, %s3564_s10   ;;  %s2627_s30 = sphi %s2715_s30, %s3563_s30  }
   0xf   : > { %s2088_s16 = sadd.s32 4294967294, %s2647_s14   ;;  %p91_p0 = scmp.ne.s32.totalorder %s2631_s10, %s2627_s30 }
  0x10   : > { %p3523_p1 = scmp.eq.s32.totalorder %s2746_s15, 0  ;;  %p277_p3 = scmp.eq.s32.totalorder %s2088_s16, 1 }
  0x11   : > { %p2089_p5 = scmp.ge.s32.totalorder %s2647_s14, 1  ;;  %p284_p7 = scmp.lt.s32.totalorder %s2647_s14, 3 }
  0x12   : > { %p2755_p4 = por %p3523_p1, %p91_p0  ;;  %p2760_p6 = por %p277_p3, %p91_p0 }
  0x13   : > { %p2765_p8 = pnand %p2089_p5, %p284_p7  ;;  %s2649_s20 = smov [#allocation7]  }
  0x14   : > { %s3536_s17 = scalar_select %p2755_p4, 1, 0 }
  0x15   : > { %s3537_s18 = scalar_select %p2760_p6, 1, 0 }
  0x16   : > { %s299_s21 = sshll.u32 %s2649_s20, 4  ;;  %p2278_p9 = pneg %p2765_p8  ;;  %s2769_s21 = int_to_ptr.vmem [resolvable:$true] %s299_s21 }
  0x17   : > { %3538 = sst [smem:[#allocation17_spill]] %s3537_s18  ;;  %s2650_s23 = smov [#allocation8]  }
  0x18   : > { %p2776_p11 = pnand %p2278_p9, %p3523_p1  ;;  %s312_s24 = sshll.u32 %s2650_s23, 4  ;;  %s2780_s24 = int_to_ptr.vmem [resolvable:$true] %s312_s24 }
  0x19   : > { %s3541_s4 = sld [smem:[#allocation21_spill]] }
  0x1a   : > { %p2439_p13 = pneg %p2776_p11 }
  0x1f   : > { %s2437_s27 = scalar_lea.hbm %s3541_s4, 256 }
  0x20   : > { %p2438_p12 = scmp.ne.s32.totalorder %s3541_s4, %s2437_s27  ;;  %p2444_p5 = scmp.lt.u32.totalorder %s2437_s27, %s3541_s4 }
  0x22   : > { %p2440_p0 = pnand %p2439_p13, %p2438_p12 }
  0x24   : > { %p2441_p3 = pneg %p2440_p0 }
  0x26   : > { %p2446_p7 = pnand %p2444_p5, %p2441_p3 }
  0x28   : > { %2449 = shalt.err (!%p2446_p7)
}
  0x29   : > { %s2450_s23 = scalar_lea.vmem %s2769_s21, 256  ;;  %p2458_p2 = scmp.lt.s32.totalorder %s2769_s21, %s2769_s21 }
  0x2a   : > { %p2451_p9 = scmp.ne.s32.totalorder %s2769_s21, %s2450_s23  ;;  %p2459_p12 = scmp.lt.s32.totalorder %s2450_s23, %s2450_s23 }
  0x2c   : > { %p2453_p10 = pnand %p2451_p9, %p2439_p13  ;;  %p2460_p0 = por %p2459_p12, %p2458_p2 }
  0x2e   : > { %p2454_p1 = pneg %p2453_p10 }
  0x30   : > { %p2461_p6 = pnand %p2460_p0, %p2454_p1 }
  0x32   : > { %2464 = shalt.err (!%p2461_p6)
}
  0x33   : > { %s2651_s25 = smov 64   ;;  %s2652_s26 = smov 4  }
  0x34   : > { %2281 = dma.hbm_to_vmem [thread:$0]  (!%p2776_p11), %s3541_s4, 256, %s2769_s21, [#allocation6], %s2651_s25, %s2651_s25, %s2652_s26  }
  0x35   : > { %s3542_s5 = sld [smem:[#allocation22_spill]] }
  0x3b   : > { %s2465_s20 = scalar_lea.hbm %s3542_s5, 256 }
  0x3c   : > { %p2466_p2 = scmp.ne.s32.totalorder %s3542_s5, %s2465_s20  ;;  %p2472_p10 = scmp.lt.u32.totalorder %s2465_s20, %s3542_s5 }
  0x3e   : > { %p2468_p1 = pnand %p2466_p2, %p2439_p13 }
  0x40   : > { %p2469_p6 = pneg %p2468_p1 }
  0x42   : > { %p2474_p3 = pnand %p2472_p10, %p2469_p6 }
  0x44   : > { %2477 = shalt.err (!%p2474_p3)
}
  0x45   : > { %s2478_s21 = scalar_lea.vmem %s2780_s24, 256  ;;  %p2486_p12 = scmp.lt.s32.totalorder %s2780_s24, %s2780_s24 }
  0x46   : > { %p2479_p5 = scmp.ne.s32.totalorder %s2780_s24, %s2478_s21  ;;  %p2487_p0 = scmp.lt.s32.totalorder %s2478_s21, %s2478_s21 }
  0x48   : > { %p2481_p7 = pnand %p2479_p5, %p2439_p13  ;;  %p2488_p2 = por %p2487_p0, %p2486_p12 }
  0x4a   : > { %p2482_p9 = pneg %p2481_p7 }
  0x4c   : > { %p2489_p1 = pnand %p2488_p2, %p2482_p9 }
  0x4e   : > { %2492 = shalt.err (!%p2489_p1)
}
  0x4f   : > { %2284 = dma.hbm_to_vmem [thread:$0]  (!%p2776_p11), %s3542_s5, 256, %s2780_s24, [#allocation9], %s2651_s25, %s2651_s25, %s2652_s26  }
  0x50   : > { %s38_s18 = sadd.s32 1, %s2643_s13  ;;  %s78_s27 = sadd.s32 1, %s2635_s11 }
  0x51   : > { %p39_p13 = scmp.ge.s32.totalorder %s38_s18, 2  ;;  %p85_p6 = scmp.ne.s32.totalorder %s2635_s11, %s2631_s10 }
  0x52   : > { %p86_p10 = scmp.eq.s32.totalorder %s2647_s14, 0  ;;  %p2298_p3 = scmp.lt.s32.totalorder %s2647_s14, 2 }
  0x53   : > { %s3569_s18 = smov (%p39_p13, %s38_s18), 0  ;;  %p3544_p7 = scmp.eq.s32.totalorder %s2746_s15, 1 }
  0x54   : > { %3543 = sst [smem:[#allocation18_spill]] %s3569_s18  ;;  %p87_p5 = por %p86_p10, %p85_p6 }
  0x55   : > { %p2844_p9 = por %p3544_p7, %p85_p6  ;;  %s73_s28 = ssub.s32 %s2643_s13, %s3569_s18 }
  0x56   : > { %s348_s29 = sand.u32 1, %s2635_s11   ;;  %p76_p11 = scmp.eq.s32.totalorder %s73_s28, 0 }
  0x57   : > { %s3545_s22 = scalar_select %p2844_p9, 1, 0 }
  0x58   : > { %s2851_s24 = sshll.u32 %s348_s29, 7  ;;  %s3527_s25 = sshll.u32 %s2643_s13, 11 }
  0x59   : > { %s2855_s26 = scalar_select %p76_p11, %s2635_s11, %s78_s27  }
  0x5a   : > { %s3547_s1 = sld [smem:[#allocation20_spill]]  ;;  %s352_s21 = scalar_lea.vmem [#allocation2], %s2851_s24 }
  0x5b   : > { %3546 = sst [smem:[#allocation19_spill]] %s2855_s26  ;;  %s361_s9 = sshll.u32 %s352_s21, 4  ;;  %s2871_s9 = int_to_ptr.vmem [resolvable:$true] %s361_s9 }
  0x5c   : > { %p2867_p12 = pnand %p2298_p3, %p87_p5  ;;  %s2873_s27 = scalar_lea.sflag [#allocation3], %s348_s29 }
  0x5e   : > { %p2495_p2 = pneg %p2867_p12 }
  0x60   : > { %s2862_s23 = scalar_lea.hbm %s3547_s1, %s3527_s25  ;;  %s2498_s21 = scalar_lea.hbm %s3547_s1, 4096 }
  0x61   : > { %s2493_s28 = scalar_lea.hbm %s2862_s23, 2048  ;;  %p2499_p6 = scmp.lt.u32.totalorder %s2862_s23, %s3547_s1 }
  0x62   : > { %p2494_p0 = scmp.ne.s32.totalorder %s2862_s23, %s2493_s28  ;;  %p2500_p10 = scmp.lt.u32.totalorder %s2498_s21, %s2493_s28 }
  0x63   : > { %p2502_p5 = scmp.lt.u32.totalorder %s2493_s28, %s2862_s23 }
  0x64   : > { %p2496_p1 = pnand %p2495_p2, %p2494_p0  ;;  %p2501_p3 = por %p2500_p10, %p2499_p6 }
  0x66   : > { %p2497_p13 = pneg %p2496_p1  ;;  %p2503_p7 = por %p2502_p5, %p2501_p3 }
  0x68   : > { %p2504_p11 = pnand %p2503_p7, %p2497_p13 }
  0x6a   : > { %2507 = shalt.err (!%p2504_p11)
}
  0x6b   : > { %s2508_s29 = scalar_lea.vmem %s2871_s9, 2048  ;;  %s2653_s16 = smov [#allocation2]  }
  0x6c   : > { %p2509_p0 = scmp.ne.s32.totalorder %s2871_s9, %s2508_s29  ;;  %s2513_s20 = sshll.u32 %s2653_s16, 4  ;;  %s2514_s20 = int_to_ptr.vmem [resolvable:$false] %s2513_s20 }
  0x6d   : > { %s2515_s4 = scalar_lea.vmem %s2514_s20, 4096  ;;  %p2516_p4 = scmp.lt.s32.totalorder %s2871_s9, %s2514_s20 }
  0x6e   : > { %p2511_p1 = pnand %p2509_p0, %p2495_p2  ;;  %p2517_p6 = scmp.lt.s32.totalorder %s2515_s4, %s2508_s29 }
  0x70   : > { %p2512_p9 = pneg %p2511_p1  ;;  %p2518_p10 = por %p2517_p6, %p2516_p4 }
  0x72   : > { %p2519_p3 = pnand %p2518_p10, %p2512_p9 }
  0x74   : > { %2522 = shalt.err (!%p2519_p3)
}
  0x75   : > { %s2654_s25 = smov 128   ;;  %s2655_s28 = smov 8  }
  0x76   : > { %2288 = dma.hbm_to_vmem [thread:$0]  (!%p2867_p12), %s2862_s23, 2048, %s2871_s9, %s2873_s27, %s2654_s25, %s2654_s25, %s2655_s28  }
  0x77   : > { %s3549_s21 = sshll.u32 %s2643_s13, 11  ;;  %s375_s4 = scalar_lea.vmem [#allocation5], %s2851_s24 }
  0x78   : > { %s2909_s20 = scalar_lea.hbm %s3515_s2, %s3549_s21  ;;  %s384_s1 = sshll.u32 %s375_s4, 4  ;;  %s2913_s1 = int_to_ptr.vmem [resolvable:$true] %s384_s1 }
  0x79   : > { %s371_s5 = sand.u32 1, %s2647_s14   ;;  %s2523_s26 = scalar_lea.hbm %s2909_s20, 2048 }
  0x7a   : > { %s2915_s18 = scalar_lea.sflag [#allocation6], %s371_s5  ;;  %p2524_p4 = scmp.ne.s32.totalorder %s2909_s20, %s2523_s26 }
  0x7b   : > { %s2528_s27 = scalar_lea.hbm %s3515_s2, 4096  ;;  %p2529_p5 = scmp.lt.u32.totalorder %s2909_s20, %s3515_s2 }
  0x7c   : > { %p2526_p9 = pnand %p2524_p4, %p2495_p2  ;;  %p2530_p7 = scmp.lt.u32.totalorder %s2528_s27, %s2523_s26 }
  0x7d   : > { %p2532_p0 = scmp.lt.u32.totalorder %s2523_s26, %s2909_s20 }
  0x7e   : > { %p2527_p13 = pneg %p2526_p9  ;;  %p2531_p11 = por %p2530_p7, %p2529_p5 }
  0x80   : > { %p2533_p1 = por %p2532_p0, %p2531_p11 }
  0x82   : > { %p2534_p6 = pnand %p2533_p1, %p2527_p13 }
  0x84   : > { %2537 = shalt.err (!%p2534_p6)
}
  0x85   : > { %s2538_s5 = scalar_lea.vmem %s2913_s1, 2048  ;;  %s2656_s24 = smov [#allocation5]  }
  0x86   : > { %p2539_p10 = scmp.ne.s32.totalorder %s2913_s1, %s2538_s5  ;;  %s2543_s16 = sshll.u32 %s2656_s24, 4  ;;  %s2544_s16 = int_to_ptr.vmem [resolvable:$false] %s2543_s16 }
  0x87   : > { %s2545_s4 = scalar_lea.vmem %s2544_s16, 4096  ;;  %p2546_p9 = scmp.lt.s32.totalorder %s2913_s1, %s2544_s16 }
  0x88   : > { %p2541_p3 = pnand %p2539_p10, %p2495_p2  ;;  %p2547_p5 = scmp.lt.s32.totalorder %s2545_s4, %s2538_s5 }
  0x8a   : > { %p2542_p4 = pneg %p2541_p3  ;;  %p2548_p7 = por %p2547_p5, %p2546_p9 }
  0x8c   : > { %p2549_p11 = pnand %p2548_p7, %p2542_p4 }
  0x8e   : > { %2552 = shalt.err (!%p2549_p11)
}
  0x8f   : > { %2291 = dma.hbm_to_vmem [thread:$0]  (!%p2867_p12), %s2909_s20, 2048, %s2913_s1, %s2915_s18, %s2654_s25, %s2654_s25, %s2655_s28  }
  0x90   : > { %396 = sbr.rel (%p2765_p8) target bundleno = 992 (0x3e0), region = 56  ;;  %s2947_s26 = sand.u32 (!%p2765_p8), 1, %s2631_s10  }
  0x91   : > { %s2100_s23 = sshll.u32 (!%p2765_p8), %s2947_s26, 7  ;;  %s399_s9 = scalar_lea.sflag (!%p2765_p8), [#allocation3], %s2947_s26 }
  0x92   : > { %s2951_s27 = scalar_lea.vmem (!%p2765_p8), [#allocation2], %s2100_s23  ;;  %p3550_p2 = scmp.ne.s32.totalorder (!%p2765_p8), %s3536_s17, 0 }
  0x97   : > { %2606 = dma.done.wait (%p3550_p2), %s399_s9, 2048  }
  0x98   : > { %2608 = vsyncadd (%p3550_p2), %s399_s9, 4294965248  ;;  %s407_s1 = sand.u32 1, %s2746_s15   ;;  %s2958_s18 = scalar_lea.vmem [#allocation5], %s2100_s23 }
  0x99   : > { %s408_s19 = scalar_lea.sflag [#allocation6], %s407_s1 }
  0x9a   : > { %2610 = dma.done.wait (%p3550_p2), %s408_s19, 2048  }
  0x9b   : > { %2612 = vsyncadd (%p3550_p2), %s408_s19, 4294965248  ;;  %p3551_p8 = scmp.eq.s32.totalorder %s2746_s15, 0 }
  0x9d   : > { %2614 = dma.done.wait (%p3551_p8), [#allocation6], 256   ;;  %p3552_p12 = pmov %p3551_p8 }
  0x9e   : > { %p3553_p13 = pmov %p3551_p8 }
  0x9f   : > { %2616 = vsyncadd (%p3552_p12), [#allocation6], 4294967040 }
  0xa0   : > { %2618 = dma.done.wait (%p3553_p13), [#allocation9], 256   ;;  %p3554_p0 = pmov %p3551_p8 }
  0xa1   : > { %p469_p1 = scmp.lt.s32.totalorder %s2639_s12, 1  ;;  %v2657_v0 = vmov 0.0   ;;  %vm2658_vm0 = vmmov 0   ;;  %v2363_v1 = vld [vmem:[%s3516_s3] sm:$0xff]   ;;  %v2365_v3 = vld [vmem:[%s3516_s3 + $0x8] sm:$0xff]   ;;  %vm541_vm1 = vcmask 261120   ;;  %v729_v57 = vlaneseq }
  0xa2   : > { %2620 = vsyncadd (%p3554_p0), [#allocation9], 4294967040  ;;  %2188 = vmatprep.subr.bf16.mxu0 %v2657_v0  ;;  %2192 = vmatprep.mubr.msk.bf16.mxu0 %vm2658_vm0, %v2657_v0  ;;  %v2364_v2 = vld [vmem:[#allocation7] sm:$0xff]   ;;  %v2366_v4 = vld [vmem:[#allocation7 + $0x8] sm:$0xff]   ;;  %s2659_s24 = smov 32   ;;  %s2661_s16 = smov 96  }
  0xa3   : > { %s470_s17 = scalar_select %p469_p1, %s2639_s12, 1  ;;  %2189 = vmatpush3.bf16.msra.mxu0 %v2363_v1  ;;  %2260 = vmatprep.subr.bf16.mxu1 %v2364_v2  ;;  %v493_v7 = vld [vmem:[%s2951_s27 + $0x40] sm:$0xff]  ;;  %v494_v9 = vld [vmem:[%s2951_s27 + $0x48] sm:$0xff]  ;;  %v495_v10 = vld [vmem:[%s2951_s27 + $0x50] sm:$0xff]  ;;  %v2660_v55 = vmov 1966171168  }
  0xa4   : > { %2190 = vmatprep.subr.bf16.mxu0 %v2657_v0  ;;  %2262 = vmatpush3.bf16.msra.mxu1 %v2364_v2  ;;  %v496_v11 = vld [vmem:[%s2951_s27 + $0x58] sm:$0xff]  ;;  %v505_v12 = vpack.c.bf16 %v494_v9, %v493_v7  ;;  %v485_v13 = vld [vmem:[%s2951_s27] sm:$0xff]  ;;  %v486_v14 = vld [vmem:[%s2951_s27 + $0x8] sm:$0xff]  ;;  %v727_v56 = vunpack.c.l.s4 %v2660_v55  ;;  %v730_v59 = vshrl.u32 %v729_v57, 7  ;;  %vm1182_vm2 = vcmask 523264   ;;  %s2104_s15 = sshll.u32 %s2947_s26, 4 }
  0xa5   : > { %s2151_s30 = sshll.u32 %s470_s17, 4  ;;  %2261 = vmatprep.subr.bf16.mxu1 %v2366_v4  ;;  %v506_v15 = vpack.c.bf16 %v496_v11, %v495_v10  ;;  %v501_v16 = vpack.c.bf16 %v486_v14, %v485_v13  ;;  %v497_v17 = vld [vmem:[%s2951_s27 + $0x60] sm:$0xff]  ;;  %v498_v18 = vld [vmem:[%s2951_s27 + $0x68] sm:$0xff]  ;;  %v487_v20 = vld [vmem:[%s2951_s27 + $0x10] sm:$0xff]  ;;  %vm1896_vm3 = vcmask 1041409   ;;  %vm1898_vm4 = vcmask 1042434  }
  0xa6   : > { %s476_s21 = scalar_lea.vmem %s3513_s0, %s2151_s30  ;;  %2208 = vmatprep.mubr.msk.bf16.mxu1 %vm541_vm1, %v505_v12  ;;  %v507_v19 = vpack.c.bf16 %v498_v18, %v497_v17  ;;  %v488_v21 = vld [vmem:[%s2951_s27 + $0x18] sm:$0xff]  ;;  %v2997_v22 = vld [vmem:[%s2958_s18 + $0x40] sm:$0xff]  ;;  %v490_v25 = vld [vmem:[%s2951_s27 + $0x28] sm:$0xff]  ;;  %v728_v58 = vunpack.c.0.s8 %v727_v56  ;;  %v3106_v13 = vsub.s32 0, %v730_v59  ;;  %vm1900_vm5 = vcmask 1043459   ;;  %s2152_s29 = sshll.u32 %s2639_s12, 8 }
  0xa7   : > { %v482_v5 = vld [vmem:[%s476_s21] sm:$0xff]  ;;  %v483_v6 = vld [vmem:[%s476_s21 + $0x8] sm:$0xff]  ;;  %2191 = vmatpush3.bf16.msra.mxu0 %v2365_v3  ;;  %v499_v26 = vld [vmem:[%s2951_s27 + $0x70] sm:$0xff]  ;;  %1608 = vrot.lane.b32.xlu1 %v2997_v22, %s2659_s24  ;;  %v502_v28 = vpack.c.bf16 %v488_v21, %v487_v20  ;;  %vm1902_vm6 = vcmask 1044484   ;;  %vm1904_vm7 = vcmask 1045509   ;;  %vm1906_vm8 = vcmask 1046534  }
  0xa8   : > { %v484_v8 = vpack.c.bf16 %v483_v6, %v482_v5  ;;  %2196 = vmatprep.subr.bf16.mxu0 %v2364_v2  ;;  %2263 = vmatpush3.bf16.msra.mxu1 %v2366_v4  ;;  %v3000_v23 = vld [vmem:[%s2958_s18] sm:$0xff]  ;;  %v500_v27 = vld [vmem:[%s2951_s27 + $0x78] sm:$0xff]  ;;  %v3013_v29 = vld [vmem:[%s2958_s18 + $0x48] sm:$0xff]  ;;  %v3092_v62 = vsub.s32 %v728_v58, %v730_v59  ;;  %vm1908_vm9 = vcmask 1047559   ;;  %s3437_s21 = scalar_lea.vmem [#allocation10], %s2104_s15  ;;  %s3555_s4 = sld [smem:[#allocation23_spill]] }
  0xa9   : > { %v489_v24 = vld [vmem:[%s2951_s27 + $0x20] sm:$0xff]  ;;  %1592 = vrot.lane.b32.xlu0 %v3000_v23, %s2659_s24  ;;  %v3016_v31 = vld [vmem:[%s2958_s18 + $0x8] sm:$0xff]  ;;  %v508_v32 = vpack.c.bf16 %v500_v27, %v499_v26  ;;  %v3019_v33 = vld [vmem:[%s2958_s18 + $0x50] sm:$0xff]  ;;  %s1937_s5 = sshll.u32 %s3437_s21, 4  ;;  %s1922_s12 = scalar_lea.sflag [#allocation4], %s2947_s26  ;;  %s3460_s5 = int_to_ptr.vmem [resolvable:$true] %s1937_s5 }
  0xaa   : > { %2193 = vmatmul.mubr.msk.bf16.vlgmr.msra.gmra.mrb[0].mxu0 %vm541_vm1, %v484_v8  ;;  %v503_v30 = vpack.c.bf16 %v490_v25, %v489_v24  ;;  %v491_v34 = vld [vmem:[%s2951_s27 + $0x30] sm:$0xff]  ;;  %v492_v35 = vld [vmem:[%s2951_s27 + $0x38] sm:$0xff]  ;;  %v3049_v40 = vld [vmem:[%s2958_s18 + $0x60] sm:$0xff]  ;;  %s2553_s9 = scalar_lea.vmem %s3460_s5, 256  ;;  %p3556_p10 = scmp.ne.s32.totalorder %s3545_s22, 0 }
  0xab   : > { %2197 = vmatpush3.bf16.msra.mxu0 %v2364_v2  ;;  %2200 = vmatprep.mubr.msk.bf16.mxu0 %vm541_vm1, %v501_v16  ;;  %v3026_v36 = vld [vmem:[%s2958_s18 + $0x10] sm:$0xff]  ;;  %v504_v37 = vpack.c.bf16 %v492_v35, %v491_v34  ;;  %v3038_v38 = vld [vmem:[%s2958_s18 + $0x58] sm:$0xff]  ;;  %v3052_v41 = vld [vmem:[%s2958_s18 + $0x20] sm:$0xff]  ;;  %p2554_p6 = scmp.ne.s32.totalorder %s3460_s5, %s2553_s9  ;;  %s2662_s27 = smov [#allocation10]  }
  0xac   : > { %2209 = vmatmul.mubr.msk.bf16.vlgmr.msra.gmra.mrb[0].mxu1 %vm541_vm1, %v506_v15  ;;  %2198 = vmatprep.subr.bf16.mxu0 %v2366_v4  ;;  %v3041_v39 = vld [vmem:[%s2958_s18 + $0x18] sm:$0xff]  ;;  %v3059_v42 = vld [vmem:[%s2958_s18 + $0x68] sm:$0xff]  ;;  %v3069_v44 = vld [vmem:[%s2958_s18 + $0x70] sm:$0xff]  ;;  %s2557_s1 = sshll.u32 %s2662_s27, 4  ;;  %s2558_s1 = int_to_ptr.vmem [resolvable:$false] %s2557_s1 }
  0xad   : > { %2212 = vmatprep.mubr.msk.bf16.mxu1 %vm541_vm1, %v507_v19  ;;  %1610 = vrot.lane.b32.xlu1 %v3013_v29, %s2659_s24  ;;  %v3062_v43 = vld [vmem:[%s2958_s18 + $0x28] sm:$0xff]  ;;  %v3072_v45 = vld [vmem:[%s2958_s18 + $0x30] sm:$0xff]  ;;  %v3079_v46 = vld [vmem:[%s2958_s18 + $0x78] sm:$0xff]  ;;  %p2555_p3 = pnand %p2554_p6, %p3556_p10  ;;  %s2559_s19 = scalar_lea.vmem %s2558_s1, 512 }
  0xae   : > { %1594 = vrot.lane.b32.xlu0 %v3016_v31, %s2659_s24  ;;  %v3082_v47 = vld [vmem:[%s2958_s18 + $0x38] sm:$0xff]  ;;  %v2367_v48 = vld [vmem:[#allocation8] sm:$0xff]   ;;  %s3458_s23 = scalar_lea.hbm %s3555_s4, %s2152_s29  ;;  %p2560_p9 = scmp.lt.s32.totalorder %s3460_s5, %s2558_s1 }
  0xaf   : > { %2199 = vmatpush3.bf16.msra.mxu0 %v2366_v4  ;;  %v2368_v49 = vld [vmem:[#allocation8 + $0x8] sm:$0xff]   ;;  %p2556_p4 = pneg %p2555_p3  ;;  %p2561_p5 = scmp.lt.s32.totalorder %s2559_s19, %s2553_s9 }
  0xb0   : > { %2216 = vmatprep.subr.bf16.mxu0 %v2367_v48 }
  0xb1   : > { %1612 = vrot.lane.b32.xlu1 %v3019_v33, %s2659_s24  ;;  %p2562_p7 = por %p2561_p5, %p2560_p9 }
  0xb2   : > { %2201 = vmatmul.mubr.msk.bf16.vlgmr.msra.gmra.mrb[4].mxu0 %vm541_vm1, %v502_v28  ;;  %1596 = vrot.lane.b32.xlu0 %v3026_v36, %s2659_s24 }
  0xb3   : > { %2204 = vmatprep.mubr.msk.bf16.mxu0 %vm541_vm1, %v503_v30  ;;  %2217 = vmatpush3.bf16.msra.mxu0 %v2367_v48  ;;  %p2563_p11 = pnand %p2562_p7, %p2556_p4 }
  0xb4   : > { %2213 = vmatmul.mubr.msk.bf16.gmra.mrb[4].mxu1 %vm541_vm1, %v508_v32  ;;  %2218 = vmatprep.subr.bf16.mxu0 %v2368_v49 }
  0xb5   : > { %1614 = vrot.lane.b32.xlu1 %v3038_v38, %s2659_s24 }
  0xb6   : > { %1598 = vrot.lane.b32.xlu0 %v3041_v39, %s2659_s24 }
  0xb7   : > { %2219 = vmatpush3.bf16.msra.mxu0 %v2368_v49 }
  0xb9   : > { %1616 = vrot.lane.b32.xlu1 %v3049_v40, %s2659_s24 }
  0xba   : > { %2205 = vmatmul.mubr.msk.bf16.gmra.mrb[8].mxu0 %vm541_vm1, %v504_v37  ;;  %1600 = vrot.lane.b32.xlu0 %v3052_v41, %s2659_s24 }
  0xbd   : > { %1618 = vrot.lane.b32.xlu1 %v3059_v42, %s2659_s24 }
  0xbe   : > { %1602 = vrot.lane.b32.xlu0 %v3062_v43, %s2659_s24 }
  0xc1   : > { %1620 = vrot.lane.b32.xlu1 %v3069_v44, %s2659_s24 }
  0xc2   : > { %1604 = vrot.lane.b32.xlu0 %v3072_v45, %s2659_s24 }
  0xc5   : > { %1622 = vrot.lane.b32.xlu1 %v3079_v46, %s2659_s24 }
  0xc6   : > { %1606 = vrot.lane.b32.xlu0 %v3082_v47, %s2659_s24 }
 0x119   : > { %v1609_v50 = vpop.permute.xlu1 %1608 }
 0x11b   : > { %v3088_v51 = vpop.permute.xlu0 %1592 }
 0x11f   : > { %v1611_v52 = vpop.permute.xlu1 %1610 }
 0x120   : > { %v3090_v53 = vpop.permute.xlu0 %1594 }
 0x123   : > { %v1613_v54 = vpop.permute.xlu1 %1612 }
 0x124   : > { %v1597_v60 = vpop.permute.xlu0 %1596 }
 0x127   : > { %v1615_v61 = vpop.permute.xlu1 %1614 }
 0x128   : > { %v3094_v0 = vpop.permute.xlu0 %1598 }
 0x12b   : > { %v3097_v4 = vpop.permute.xlu1 %1616 }
 0x12c   : > { %v3122_v37 = vpop.permute.xlu0 %1600 }
 0x12f   : > { %v3128_v55 = vpop.permute.xlu1 %1618 }
 0x17d   : > { %v579_v63 = vpop.f32.mrb[0].mxu0 }
 0x17e   : > { %v725_v1 = vcombine.high %v579_v63, %v579_v63  ;;  %v732_v2 = vrot.slane %v579_v63, %v3092_v62  ;;  %v2194_v3 = vpop.f32.mrb[1].mxu0 }
 0x17f   : > { %v3099_v5 = vpop.f32.mrb[0].mxu1  ;;  %v582_v6 = vpop.f32.mrb[2].mxu0 }
 0x180   : > { %v3102_v7 = vrot.slane %v725_v1, %v3092_v62  ;;  %v740_v8 = vcombine.high %v732_v2, %v732_v2  ;;  %v748_v9 = vrot.slane %v732_v2, %v3092_v62  ;;  %v1650_v10 = vadd.f32 %v3099_v5, %v1613_v54  ;;  %v2195_v11 = vpop.f32.mrb[3].mxu0  ;;  %v692_v12 = vpop.f32.mrb[1].mxu1 }
 0x181   : > { %v774_v14 = vcombine.high %v582_v6, %v582_v6  ;;  %v781_v15 = vrot.slane %v582_v6, %v3092_v62  ;;  %v1648_v16 = vadd.f32 %v1609_v50, %v692_v12  ;;  %v2211_v17 = vpop.f32.mrb[2].mxu1 }
 0x182   : > { %v3110_v18 = vrot.slane %v740_v8, %v3092_v62  ;;  %1692 = vrot.lane.b32.xlu1 %v1650_v10, %s2661_s16  ;;  %v1651_v19 = vadd.f32 %v2211_v17, %v1615_v61  ;;  %v695_v20 = vpop.f32.mrb[3].mxu1  ;;  %v770_v26 = vcombine.high %v748_v9, %v748_v9  ;;  %v741_v27 = vcombine.high %v3102_v7, %v3102_v7 }
 0x183   : > { %v788_v21 = vrot.slane %v774_v14, %v3092_v62  ;;  %v789_v24 = vcombine.high %v781_v15, %v781_v15  ;;  %v797_v25 = vrot.slane %v781_v15, %v3092_v62  ;;  %1688 = vrot.lane.b32.xlu0 %v1648_v16, %s2661_s16  ;;  %v1649_v28 = vadd.f32 %v1611_v52, %v695_v20 }
 0x184   : > { %v772_v30 = vcombine.high %v3110_v18, %v3110_v18  ;;  %v826_v49 = vrot.slane %v748_v9, %v3106_v13  ;;  %v834_v54 = vrot.slane %v770_v26, %v3106_v13  ;;  %v3137_v3 = vrot.slane %v3102_v7, %v3092_v62 }
 0x185   : > { %v804_v32 = vrot.slane %v788_v21, %v3092_v62  ;;  %v811_v34 = vrot.slane %v789_v24, %v3092_v62  ;;  %v819_v35 = vcombine.high %v797_v25, %v797_v25  ;;  %v2202_v48 = vpop.f32.mrb[4].mxu0  ;;  %v858_v50 = vrot.slane %v797_v25, %v3106_v13 }
 0x186   : > { %1694 = vrot.lane.b32.xlu1 %v1651_v19, %s2661_s16  ;;  %v1642_v52 = vadd.f32 %v2202_v48, %v1597_v60  ;;  %v660_v56 = vpop.f32.mrb[5].mxu0  ;;  %v838_v57 = vrot.slane %v772_v30, %v3106_v13  ;;  %v905_v60 = vsub.f32 %v834_v54, %v2202_v48  ;;  %v790_v11 = vcombine.high %v788_v21, %v788_v21  ;;  %v3164_v48 = vpop.permute.xlu0 %1602 }
 0x187   : > { %v866_v58 = vrot.slane %v819_v35, %v3106_v13  ;;  %v821_v59 = vcombine.high %v811_v34, %v811_v34  ;;  %v862_v61 = vrot.slane %v811_v34, %v3106_v13  ;;  %v903_v63 = vsub.f32 %v826_v49, %v660_v56  ;;  %v3133_v1 = vpop.f32.mrb[4].mxu1  ;;  %v2203_v2 = vpop.f32.mrb[6].mxu0 }
 0x188   : > { %v911_v6 = vsub.f32 %v858_v50, %v692_v12  ;;  %v820_v8 = vcombine.high %v804_v32, %v804_v32  ;;  %v708_v9 = vpop.f32.mrb[5].mxu1  ;;  %1676 = vrot.lane.b32.xlu0 %v1642_v52, %s2661_s16  ;;  %v3140_v10 = vpop.f32.mrb[7].mxu0  ;;  %v1640_v24 = vadd.f32 %v3088_v51, %v660_v56  ;;  %v906_v12 = vsub.f32 %v838_v57, %v2203_v2 }
 0x189   : > { %v870_v14 = vrot.slane %v821_v59, %v3106_v13  ;;  %v913_v15 = vsub.f32 %v866_v58, %v3099_v5  ;;  %v912_v16 = vsub.f32 %v862_v61, %v695_v20  ;;  %v3144_v19 = vpop.f32.mrb[6].mxu1  ;;  %v830_v26 = vrot.slane %v3110_v18, %v3106_v13 }
 0x18a   : > { %v882_v25 = vrot.slane %v820_v8, %v3106_v13  ;;  %1690 = vrot.lane.b32.xlu1 %v1649_v28, %s2661_s16  ;;  %v3151_v30 = vpop.f32.mrb[7].mxu1  ;;  %v3154_v21 = vadd.f32 %v911_v6, %v2997_v22  ;;  %v921_v5 = vadd.f32 %v905_v60, %v3026_v36  ;;  %v922_v18 = vadd.f32 %v906_v12, %v3041_v39  ;;  %v1605_v8 = vpop.permute.xlu0 %1604 }
 0x18b   : > { %v914_v34 = vsub.f32 %v870_v14, %v2211_v17  ;;  %v3158_v20 = vadd.f32 %v912_v16, %v3013_v29  ;;  %v3161_v51 = vadd.f32 %v913_v15, %v3019_v33  ;;  %v874_v28 = vrot.slane %v804_v32, %v3106_v13  ;;  %v1621_v17 = vpop.permute.xlu1 %1620 }
 0x18c   : > { %v917_v35 = vsub.f32 %v882_v25, %v3133_v1  ;;  %1672 = vrot.lane.b32.xlu0 %v1640_v24, %s2661_s16  ;;  %v818_v36 = vrot.slane %v790_v11, %v3092_v62  ;;  %v904_v33 = vsub.f32 %v830_v26, %v3140_v10  ;;  %v919_v50 = vadd.f32 %v903_v63, %v3000_v23 }
 0x18d   : > { %v3170_v22 = vadd.f32 %v914_v34, %v3038_v38  ;;  %v939_v29 = vpack.c.bf16 %v3158_v20, %v3154_v21  ;;  %v2206_v49 = vpop.f32.mrb[8].mxu0  ;;  %v936_v54 = vpack.c.bf16 %v922_v18, %v921_v5  ;;  %v1643_v39 = vadd.f32 %v2203_v2, %v3094_v0  ;;  %v3257_v20 = vld [vmem:[%s3521_s8] ss:$0 sm:$0xff] }
 0x18e   : > { %v915_v32 = vsub.f32 %v874_v28, %v708_v9  ;;  %v676_v52 = vpop.f32.mrb[9].mxu0  ;;  %v822_v56 = vcombine.high %v818_v36, %v818_v36  ;;  %v920_v57 = vadd.f32 %v904_v33, %v3016_v31  ;;  %v878_v58 = vrot.slane %v818_v36, %v3106_v13 }
 0x18f   : > { %v940_v38 = vpack.c.bf16 %v3170_v22, %v3161_v51  ;;  %v2207_v59 = vpop.f32.mrb[10].mxu0  ;;  %v1654_v61 = vadd.f32 %v3133_v1, %v1621_v17  ;;  %v771_v6 = vcombine.high %v3137_v3, %v3137_v3  ;;  %v1652_v60 = vadd.f32 %v3097_v4, %v708_v9 }
 0x190   : > { %1678 = vrot.lane.b32.xlu0 %v1643_v39, %s2661_s16  ;;  %v679_v23 = vpop.f32.mrb[11].mxu0  ;;  %v886_v0 = vrot.slane %v822_v56, %v3106_v13  ;;  %v935_v63 = vpack.c.bf16 %v920_v57, %v919_v50  ;;  %v916_v2 = vsub.f32 %v878_v58, %v3151_v30  ;;  %v842_v1 = vrot.slane %v3137_v3, %v3106_v13 }
 0x191   : > { %1700 = vrot.lane.b32.xlu1 %v1654_v61, %s2661_s16  ;;  %v850_v31 = vrot.slane %v771_v6, %v3106_v13  ;;  %v769_v11 = vrot.slane %v741_v27, %v3092_v62  ;;  %v931_v14 = vadd.f32 %v915_v32, %v3049_v40  ;;  %v1646_v4 = vadd.f32 %v2206_v49, %v1605_v8  ;;  %v2369_v62 = vld [vmem:[%s3519_s6] sm:$0xff]  }
 0x192   : > { %v918_v15 = vsub.f32 %v886_v0, %v3144_v19  ;;  %v932_v16 = vadd.f32 %v916_v2, %v3059_v42  ;;  %2220 = vmatprep.mubr.msk.bf16.mxu0 %vm541_vm1, %v935_v63  ;;  %v907_v24 = vsub.f32 %v842_v1, %v676_v52  ;;  %v933_v40 = vadd.f32 %v917_v35, %v3069_v44 }
 0x193   : > { %v909_v9 = vsub.f32 %v850_v31, %v2206_v49  ;;  %v773_v25 = vcombine.high %v769_v11, %v769_v11  ;;  %v846_v12 = vrot.slane %v769_v11, %v3106_v13  ;;  %2221 = vmatmul.mubr.msk.bf16.vlgmr.msra.gmra.mrb[12].mxu0 %vm541_vm1, %v936_v54  ;;  %v1644_v34 = vadd.f32 %v3122_v37, %v676_v52 }
 0x194   : > { %v934_v7 = vadd.f32 %v918_v15, %v3079_v46  ;;  %v941_v27 = vpack.c.bf16 %v932_v16, %v931_v14  ;;  %1684 = vrot.lane.b32.xlu0 %v1646_v4, %s2661_s16  ;;  %2236 = vmatprep.subr.bf16.mxu1 %v2369_v62  ;;  %v1641_v5 = vadd.f32 %v3090_v53, %v3140_v10  ;;  %v1623_v10 = vpop.permute.xlu1 %1622 }
 0x195   : > { %v854_v42 = vrot.slane %v773_v25, %v3106_v13  ;;  %v908_v3 = vsub.f32 %v846_v12, %v679_v23  ;;  %1696 = vrot.lane.b32.xlu1 %v1652_v60, %s2661_s16  ;;  %v923_v18 = vadd.f32 %v907_v24, %v3052_v41  ;;  %2237 = vmatpush3.bf16.msra.mxu1 %v2369_v62  ;;  %v1607_v41 = vpop.permute.xlu0 %1606 }
 0x196   : > { %v942_v26 = vpack.c.bf16 %v934_v7, %v933_v40  ;;  %v1653_v13 = vadd.f32 %v3128_v55, %v3151_v30  ;;  %v925_v35 = vadd.f32 %v909_v9, %v3072_v45  ;;  %v1645_v53 = vadd.f32 %v3164_v48, %v679_v23  ;;  %v2371_v55 = vld [vmem:[%s3519_s6 + $0x10] sm:$0xff]   ;;  %v3252_v30 = vld [vmem:[%s3520_s7] ss:$0 sm:$0xff] }
 0x197   : > { %v910_v44 = vsub.f32 %v854_v42, %v2207_v59  ;;  %v924_v46 = vadd.f32 %v908_v3, %v3062_v43  ;;  %v1655_v43 = vadd.f32 %v3144_v19, %v1623_v10  ;;  %v1647_v45 = vadd.f32 %v2207_v59, %v1607_v41  ;;  %v2372_v19 = vld [vmem:[%s3519_s6 + $0x18] sm:$0xff]  }
 0x198   : > { %1680 = vrot.lane.b32.xlu0 %v1644_v34, %s2661_s16 }
 0x199   : > { %v926_v28 = vadd.f32 %v910_v44, %v3082_v47  ;;  %v937_v37 = vpack.c.bf16 %v924_v46, %v923_v18  ;;  %1674 = vrot.lane.b32.xlu1 %v1641_v5, %s2661_s16  ;;  %v2370_v47 = vld [vmem:[%s3519_s6 + $0x8] sm:$0xff]  }
 0x19a   : > { %2238 = vmatprep.subr.bf16.mxu1 %v2370_v47 }
 0x19b   : > { %v938_v36 = vpack.c.bf16 %v926_v28, %v925_v35  ;;  %2224 = vmatprep.mubr.msk.bf16.mxu0 %vm541_vm1, %v937_v37  ;;  %2239 = vmatpush3.bf16.msra.mxu1 %v2370_v47 }
 0x19c   : > { %1682 = vrot.lane.b32.xlu0 %v1645_v53, %s2661_s16  ;;  %2240 = vmatprep.subr.bf16.mxu1 %v2371_v55 }
 0x19d   : > { %2225 = vmatmul.mubr.msk.bf16.gmra.mrb[16].mxu0 %vm541_vm1, %v938_v36  ;;  %1698 = vrot.lane.b32.xlu1 %v1653_v13, %s2661_s16 }
 0x19e   : > { %2228 = vmatprep.mubr.msk.bf16.mxu0 %vm541_vm1, %v939_v29 }
 0x19f   : > { %2241 = vmatpush3.bf16.msra.mxu1 %v2371_v55 }
 0x1a0   : > { %1686 = vrot.lane.b32.xlu0 %v1647_v45, %s2661_s16  ;;  %2242 = vmatprep.subr.bf16.mxu1 %v2372_v19 }
 0x1a1   : > { %1702 = vrot.lane.b32.xlu1 %v1655_v43, %s2661_s16 }
 0x1a3   : > { %2243 = vmatpush3.bf16.msra.mxu1 %v2372_v19 }
 0x1a5   : > { %2229 = vmatmul.mubr.msk.bf16.gmra.mrb[20].mxu0 %vm541_vm1, %v940_v38 }
 0x1a6   : > { %2232 = vmatprep.mubr.msk.bf16.mxu0 %vm541_vm1, %v941_v27 }
 0x1ad   : > { %2233 = vmatmul.mubr.msk.bf16.gmra.mrb[24].mxu0 %vm541_vm1, %v942_v26 }
 0x266   : > { %v2222_v21 = vpop.f32.mrb[12].mxu0 }
 0x267   : > { %v1089_v51 = vmul.f32 %v2222_v21, %v3252_v30  ;;  %v1017_v48 = vpop.f32.mrb[13].mxu0 }
 0x268   : > { %v1087_v22 = vmul.f32 %v3252_v30, %v1017_v48  ;;  %v2223_v29 = vpop.f32.mrb[14].mxu0 }
 0x269   : > { %v1112_v33 = vadd.f32 %v3257_v20, %v1089_v51  ;;  %v1090_v17 = vmul.f32 %v2223_v29, %v3252_v30  ;;  %v1020_v49 = vpop.f32.mrb[15].mxu0 }
 0x26a   : > { %v1110_v50 = vadd.f32 %v3257_v20, %v1087_v22  ;;  %v1088_v54 = vmul.f32 %v3252_v30, %v1020_v49 }
 0x26b   : > { %v1113_v39 = vadd.f32 %v3257_v20, %v1090_v17  ;;  %v1128_v52 = vmax.f32 %v1112_v33, 0.0 }
 0x26c   : > { %v1111_v32 = vadd.f32 %v3257_v20, %v1088_v54  ;;  %v1126_v56 = vmax.f32 %v1110_v50, 0.0 }
 0x26d   : > { %v1129_v38 = vmax.f32 %v1113_v39, 0.0 }
 0x26e   : > { %v1127_v57 = vmax.f32 %v1111_v32, 0.0 }
 0x26f   : > { %v1143_v58 = vpack.c.bf16 %v1129_v38, %v1128_v52 }
 0x270   : > { %v1142_v59 = vpack.c.bf16 %v1127_v57, %v1126_v56  ;;  %v2226_v61 = vpop.f32.mrb[16].mxu0 }
 0x271   : > { %v1093_v6 = vmul.f32 %v2226_v61, %v3252_v30  ;;  %v1033_v23 = vpop.f32.mrb[17].mxu0 }
 0x272   : > { %v1091_v0 = vmul.f32 %v3252_v30, %v1033_v23  ;;  %v2227_v63 = vpop.f32.mrb[18].mxu0  ;;  %2244 = vmatprep.mubr.msk.bf16.mxu1 %vm1182_vm2, %v1142_v59  ;;  %v3302_v59 = vpop.permute.xlu1 %1692 }
 0x273   : > { %v1116_v2 = vadd.f32 %v3257_v20, %v1093_v6  ;;  %v1094_v60 = vmul.f32 %v2227_v63, %v3252_v30  ;;  %v1036_v8 = vpop.f32.mrb[19].mxu0  ;;  %2245 = vmatmul.mubr.msk.bf16.vlgmr.msra.gmra.mrb[8].mxu1 %vm1182_vm2, %v1143_v58 }
 0x274   : > { %v1114_v31 = vadd.f32 %v3257_v20, %v1091_v0  ;;  %v1092_v1 = vmul.f32 %v3252_v30, %v1036_v8  ;;  %v3305_v8 = vpop.permute.xlu0 %1688 }
 0x275   : > { %v1117_v11 = vadd.f32 %v3257_v20, %v1094_v60  ;;  %v1132_v15 = vmax.f32 %v1116_v2, 0.0 }
 0x276   : > { %v1115_v14 = vadd.f32 %v3257_v20, %v1092_v1  ;;  %v1130_v4 = vmax.f32 %v1114_v31, 0.0 }
 0x277   : > { %v1133_v16 = vmax.f32 %v1117_v11, 0.0 }
 0x278   : > { %v1131_v9 = vmax.f32 %v1115_v14, 0.0  ;;  %v2230_v24 = vpop.f32.mrb[20].mxu0 }
 0x279   : > { %v1145_v25 = vpack.c.bf16 %v1133_v16, %v1132_v15  ;;  %v1097_v12 = vmul.f32 %v2230_v24, %v3252_v30  ;;  %v1049_v62 = vpop.f32.mrb[21].mxu0 }
 0x27a   : > { %v1144_v40 = vpack.c.bf16 %v1131_v9, %v1130_v4  ;;  %v1095_v7 = vmul.f32 %v3252_v30, %v1049_v62  ;;  %v2231_v27 = vpop.f32.mrb[22].mxu0  ;;  %v3307_v4 = vpop.permute.xlu1 %1694 }
 0x27b   : > { %v1120_v42 = vadd.f32 %v3257_v20, %v1097_v12  ;;  %v1098_v3 = vmul.f32 %v2231_v27, %v3252_v30  ;;  %v1052_v26 = vpop.f32.mrb[23].mxu0 }
 0x27c   : > { %v1118_v34 = vadd.f32 %v3257_v20, %v1095_v7  ;;  %v1096_v5 = vmul.f32 %v3252_v30, %v1052_v26  ;;  %2248 = vmatprep.mubr.msk.bf16.mxu1 %vm1182_vm2, %v1144_v40 }
 0x27d   : > { %v1121_v18 = vadd.f32 %v3257_v20, %v1098_v3  ;;  %2249 = vmatmul.mubr.msk.bf16.gmra.mrb[12].mxu1 %vm1182_vm2, %v1145_v25  ;;  %v1136_v46 = vmax.f32 %v1120_v42, 0.0 }
 0x27e   : > { %v1119_v44 = vadd.f32 %v3257_v20, %v1096_v5  ;;  %v1134_v35 = vmax.f32 %v1118_v34, 0.0  ;;  %v3311_v5 = vpop.permute.xlu0 %1676 }
 0x27f   : > { %v1137_v13 = vmax.f32 %v1121_v18, 0.0 }
 0x280   : > { %v1135_v28 = vmax.f32 %v1119_v44, 0.0  ;;  %v2234_v37 = vpop.f32.mrb[24].mxu0 }
 0x281   : > { %v1147_v53 = vpack.c.bf16 %v1137_v13, %v1136_v46  ;;  %v1101_v10 = vmul.f32 %v2234_v37, %v3252_v30  ;;  %v1065_v41 = vpop.f32.mrb[25].mxu0 }
 0x282   : > { %v1146_v36 = vpack.c.bf16 %v1135_v28, %v1134_v35  ;;  %v1099_v43 = vmul.f32 %v3252_v30, %v1065_v41  ;;  %v2235_v45 = vpop.f32.mrb[26].mxu0 }
 0x283   : > { %v1124_v47 = vadd.f32 %v3257_v20, %v1101_v10  ;;  %v1102_v55 = vmul.f32 %v2235_v45, %v3252_v30  ;;  %v1068_v19 = vpop.f32.mrb[27].mxu0 }
 0x284   : > { %v1122_v21 = vadd.f32 %v3257_v20, %v1099_v43  ;;  %v1100_v51 = vmul.f32 %v3252_v30, %v1068_v19  ;;  %2252 = vmatprep.mubr.msk.bf16.mxu1 %vm1182_vm2, %v1146_v36 }
 0x285   : > { %v1125_v48 = vadd.f32 %v3257_v20, %v1102_v55  ;;  %2253 = vmatmul.mubr.msk.bf16.gmra.mrb[16].mxu1 %vm1182_vm2, %v1147_v53  ;;  %v1140_v29 = vmax.f32 %v1124_v47, 0.0  ;;  %v3318_v47 = vpop.permute.xlu1 %1690 }
 0x286   : > { %v1123_v22 = vadd.f32 %v3257_v20, %v1100_v51  ;;  %v1138_v17 = vmax.f32 %v1122_v21, 0.0 }
 0x287   : > { %v1141_v33 = vmax.f32 %v1125_v48, 0.0 }
 0x288   : > { %v1139_v49 = vmax.f32 %v1123_v22, 0.0 }
 0x289   : > { %v1149_v50 = vpack.c.bf16 %v1141_v33, %v1140_v29 }
 0x28a   : > { %v1148_v54 = vpack.c.bf16 %v1139_v49, %v1138_v17 }
 0x28c   : > { %2256 = vmatprep.mubr.msk.bf16.mxu1 %vm1182_vm2, %v1148_v54 }
 0x28d   : > { %2257 = vmatmul.mubr.msk.bf16.gmra.mrb[20].mxu1 %vm1182_vm2, %v1149_v50 }
 0x346   : > { %v2246_v39 = vpop.f32.mrb[8].mxu1 }
 0x347   : > { %v1318_v30 = vsel %vm541_vm1, %v2246_v39, -inf  ;;  %v1241_v32 = vpop.f32.mrb[9].mxu1 }
 0x348   : > { %v1319_v52 = vrot.slane %v1318_v30, 4  ;;  %v1304_v38 = vsel %vm541_vm1, %v1241_v32, -inf  ;;  %v2247_v56 = vpop.f32.mrb[10].mxu1 }
 0x349   : > { %v1305_v57 = vrot.slane %v1304_v38, 4  ;;  %v1325_v20 = vsel %vm541_vm1, %v2247_v56, -inf  ;;  %v1244_v58 = vpop.f32.mrb[11].mxu1 }
 0x34a   : > { %v1320_v61 = vmax.f32 %v1318_v30, %v1319_v52  ;;  %v1326_v6 = vrot.slane %v1325_v20, 4  ;;  %v1311_v23 = vsel %vm541_vm1, %v1244_v58, -inf }
 0x34b   : > { %v1306_v0 = vmax.f32 %v1304_v38, %v1305_v57  ;;  %v1312_v63 = vrot.slane %v1311_v23, 4 }
 0x34c   : > { %v1321_v2 = vrot.slane %v1320_v61, 2  ;;  %v1327_v60 = vmax.f32 %v1325_v20, %v1326_v6 }
 0x34d   : > { %v1307_v31 = vrot.slane %v1306_v0, 2  ;;  %v1313_v1 = vmax.f32 %v1311_v23, %v1312_v63  ;;  %v3328_v23 = vpop.permute.xlu1 %1700 }
 0x34e   : > { %v1322_v11 = vmax.f32 %v1320_v61, %v1321_v2  ;;  %v1328_v14 = vrot.slane %v1327_v60, 2 }
 0x34f   : > { %v1308_v15 = vmax.f32 %v1306_v0, %v1307_v31  ;;  %v1314_v16 = vrot.slane %v1313_v1, 2 }
 0x350   : > { %v1323_v9 = vrot.slane %v1322_v11, 1  ;;  %v1329_v24 = vmax.f32 %v1327_v60, %v1328_v14  ;;  %v2250_v25 = vpop.f32.mrb[12].mxu1 }
 0x351   : > { %v1309_v12 = vrot.slane %v1308_v15, 1  ;;  %v1315_v62 = vmax.f32 %v1313_v1, %v1314_v16  ;;  %v1346_v40 = vsel %vm541_vm1, %v2250_v25, -inf  ;;  %v1257_v7 = vpop.f32.mrb[13].mxu1 }
 0x352   : > { %v1324_v27 = vmax.f32 %v1322_v11, %v1323_v9  ;;  %v1330_v42 = vrot.slane %v1329_v24, 1  ;;  %v1347_v3 = vrot.slane %v1346_v40, 4  ;;  %v1332_v26 = vsel %vm541_vm1, %v1257_v7, -inf  ;;  %v2251_v34 = vpop.f32.mrb[14].mxu1 }
 0x353   : > { %v1310_v18 = vmax.f32 %v1308_v15, %v1309_v12  ;;  %v1316_v44 = vrot.slane %v1315_v62, 1  ;;  %v1333_v46 = vrot.slane %v1332_v26, 4  ;;  %v1353_v13 = vsel %vm541_vm1, %v2251_v34, -inf  ;;  %v3314_v35 = vpop.f32.mrb[15].mxu1 }
 0x354   : > { %v1418_v28 = vsub.f32 %v2246_v39, %v1324_v27  ;;  %v1331_v37 = vmax.f32 %v1329_v24, %v1330_v42  ;;  %v1348_v53 = vmax.f32 %v1346_v40, %v1347_v3  ;;  %v1354_v10 = vrot.slane %v1353_v13, 4  ;;  %v1673_v39 = vpop.permute.xlu0 %1672  ;;  %v3336_v42 = vpop.permute.xlu1 %1696 }
 0x355   : > { %v1416_v41 = vsub.f32 %v1241_v32, %v1310_v18  ;;  %v1317_v36 = vmax.f32 %v1315_v62, %v1316_v44  ;;  %v1334_v43 = vmax.f32 %v1332_v26, %v1333_v46  ;;  %v1339_v45 = vsel %vm541_vm1, %v3314_v35, -inf }
 0x356   : > { %v1436_v55 = vmul.f32 1.442695, %v1418_v28  ;;  %v1419_v19 = vsub.f32 %v2247_v56, %v1331_v37  ;;  %v1349_v21 = vrot.slane %v1348_v53, 2  ;;  %v1355_v51 = vmax.f32 %v1353_v13, %v1354_v10 }
 0x357   : > { %v1432_v48 = vmul.f32 1.442695, %v1416_v41  ;;  %v1417_v22 = vsub.f32 %v1244_v58, %v1317_v36  ;;  %v1335_v29 = vrot.slane %v1334_v43, 2  ;;  %v1340_v33 = vrot.slane %v1339_v45, 4 }
 0x358   : > { %2373 = vpow2.f32 %v1436_v55  ;;  %v1438_v17 = vmul.f32 1.442695, %v1419_v19  ;;  %v1350_v49 = vmax.f32 %v1348_v53, %v1349_v21  ;;  %v1356_v50 = vrot.slane %v1355_v51, 2  ;;  %v3320_v54 = vpop.f32.mrb[16].mxu1  ;;  %v1679_v11 = vpop.permute.xlu0 %1678 }
 0x359   : > { %2375 = vpow2.f32 %v1432_v48  ;;  %v1434_v30 = vmul.f32 1.442695, %v1417_v22  ;;  %v1336_v32 = vmax.f32 %v1334_v43, %v1335_v29  ;;  %v1341_v52 = vmax.f32 %v1339_v45, %v1340_v33  ;;  %v3322_v38 = vpop.f32.mrb[17].mxu1 }
 0x35a   : > { %2377 = vpow2.f32 %v1438_v17  ;;  %v1351_v56 = vrot.slane %v1350_v49, 1  ;;  %v1357_v57 = vmax.f32 %v1355_v51, %v1356_v50  ;;  %v3324_v20 = vpop.f32.mrb[18].mxu1  ;;  %v1374_v1 = vsel %vm541_vm1, %v3320_v54, -inf }
 0x35b   : > { %2379 = vpow2.f32 %v1434_v30  ;;  %v1337_v58 = vrot.slane %v1336_v32, 1  ;;  %v1342_v61 = vrot.slane %v1341_v52, 2  ;;  %v3326_v6 = vpop.f32.mrb[19].mxu1  ;;  %v1375_v62 = vrot.slane %v1374_v1, 4 }
 0x35c   : > { %v1352_v0 = vmax.f32 %v1350_v49, %v1351_v56  ;;  %v1358_v63 = vrot.slane %v1357_v57, 1  ;;  %v3340_v3 = vsel %vm541_vm1, %v3322_v38, -inf  ;;  %v1685_v36 = vpop.permute.xlu0 %1684  ;;  %v1675_v49 = vpop.permute.xlu1 %1674 }
 0x35d   : > { %v1338_v2 = vmax.f32 %v1336_v32, %v1337_v58  ;;  %v1343_v15 = vmax.f32 %v1341_v52, %v1342_v61 }
 0x35e   : > { %v1422_v60 = vsub.f32 %v2250_v25, %v1352_v0  ;;  %v1359_v31 = vmax.f32 %v1357_v57, %v1358_v63  ;;  %v1376_v63 = vmax.f32 %v1374_v1, %v1375_v62 }
 0x35f   : > { %v1420_v14 = vsub.f32 %v1257_v7, %v1338_v2  ;;  %v3344_v7 = vsel %vm541_vm1, %v3324_v20, -inf  ;;  %v1344_v46 = vrot.slane %v1343_v15, 1  ;;  %v1361_v2 = vrot.slane %v3340_v3, 4 }
 0x360   : > { %v1444_v16 = vmul.f32 1.442695, %v1422_v60  ;;  %v1423_v9 = vsub.f32 %v2251_v34, %v1359_v31  ;;  %v3332_v24 = vpop.f32.mrb[20].mxu1  ;;  %v1681_v60 = vpop.permute.xlu0 %1680 }
 0x361   : > { %v1440_v12 = vmul.f32 1.442695, %v1420_v14  ;;  %v3334_v40 = vpop.f32.mrb[21].mxu1 }
 0x362   : > { %v2374_v27 = vpop.eup %2373  ;;  %2381 = vpow2.f32 %v1444_v16  ;;  %v1446_v25 = vmul.f32 1.442695, %v1423_v9  ;;  %v3346_v26 = vpop.f32.mrb[22].mxu1  ;;  %v1345_v16 = vmax.f32 %v1343_v15, %v1344_v46  ;;  %v1367_v15 = vsel %vm541_vm1, %v3326_v6, -inf }
 0x363   : > { %v2376_v34 = vpop.eup %2375  ;;  %v1478_v18 = vsel %vm541_vm1, %v2374_v27, 0.0  ;;  %v1722_v44 = vmul.f32 %v2374_v27, %v3311_v5  ;;  %2383 = vpow2.f32 %v1440_v12  ;;  %v3350_v13 = vpop.f32.mrb[23].mxu1 }
 0x364   : > { %v2378_v28 = vpop.eup %2377  ;;  %v1479_v37 = vrot.slane %v1478_v18, 4  ;;  %v1464_v53 = vsel %vm541_vm1, %v2376_v34, 0.0  ;;  %v1720_v10 = vmul.f32 %v2376_v34, %v1673_v39  ;;  %2385 = vpow2.f32 %v1446_v25 }
 0x365   : > { %v2380_v41 = vpop.eup %2379  ;;  %v1750_v43 = vsel %vm541_vm1, %v1722_v44, 0.0  ;;  %v1465_v45 = vrot.slane %v1464_v53, 4  ;;  %v1485_v55 = vsel %vm541_vm1, %v2378_v28, 0.0  ;;  %v1723_v19 = vmul.f32 %v2378_v28, %v1679_v11 }
 0x366   : > { %v1480_v21 = vadd.f32 %v1479_v37, %v1478_v18  ;;  %v1751_v5 = vrot.slane %v1750_v43, 4  ;;  %v1736_v51 = vsel %vm541_vm1, %v1720_v10, 0.0  ;;  %v1486_v48 = vrot.slane %v1485_v55, 4 }
 0x367   : > { %v1466_v22 = vadd.f32 %v1465_v45, %v1464_v53  ;;  %v1737_v29 = vrot.slane %v1736_v51, 4  ;;  %v1757_v33 = vsel %vm541_vm1, %v1723_v19, 0.0  ;;  %v1471_v17 = vsel %vm541_vm1, %v2380_v41, 0.0 }
 0x368   : > { %v1481_v50 = vrot.slane %v1480_v21, 2  ;;  %v1752_v39 = vadd.f32 %v1751_v5, %v1750_v43  ;;  %v1487_v30 = vadd.f32 %v1486_v48, %v1485_v55  ;;  %v1758_v32 = vrot.slane %v1757_v33, 4 }
 0x369   : > { %v1467_v52 = vrot.slane %v1466_v22, 2  ;;  %v1738_v56 = vadd.f32 %v1737_v29, %v1736_v51  ;;  %v1472_v57 = vrot.slane %v1471_v17, 4  ;;  %v1721_v58 = vmul.f32 %v2380_v41, %v1675_v49  ;;  %v3367_v51 = vpop.permute.xlu0 %1682 }
 0x36a   : > { %v1482_v61 = vadd.f32 %v1481_v50, %v1480_v21  ;;  %v1488_v0 = vrot.slane %v1487_v30, 2  ;;  %v1753_v27 = vrot.slane %v1752_v39, 2  ;;  %v1759_v34 = vadd.f32 %v1758_v32, %v1757_v33 }
 0x36b   : > { %v1468_v31 = vadd.f32 %v1467_v52, %v1466_v22  ;;  %v1473_v11 = vadd.f32 %v1472_v57, %v1471_v17  ;;  %v1743_v14 = vsel %vm541_vm1, %v1721_v58, 0.0  ;;  %v1739_v28 = vrot.slane %v1738_v56, 2 }
 0x36c   : > { %v2382_v9 = vpop.eup %2381  ;;  %v1483_v12 = vrot.slane %v1482_v61, 1  ;;  %v1489_v25 = vadd.f32 %v1488_v0, %v1487_v30  ;;  %v1744_v53 = vrot.slane %v1743_v14, 4  ;;  %v1382_v41 = vrot.slane %v3344_v7, 4 }
 0x36d   : > { %v2384_v18 = vpop.eup %2383  ;;  %v1469_v44 = vrot.slane %v1468_v31, 1  ;;  %v1474_v37 = vrot.slane %v1473_v11, 2  ;;  %v1754_v46 = vadd.f32 %v1753_v27, %v1752_v39  ;;  %v1421_v19 = vsub.f32 %v3314_v35, %v1345_v16 }
 0x36e   : > { %v2386_v10 = vpop.eup %2385  ;;  %v1484_v1 = vadd.f32 %v1483_v12, %v1482_v61  ;;  %v1490_v62 = vrot.slane %v1489_v25, 1  ;;  %v1745_v55 = vadd.f32 %v1744_v53, %v1743_v14  ;;  %v1377_v21 = vrot.slane %v1376_v63, 2 }
 0x36f   : > { %v1470_v43 = vadd.f32 %v1469_v44, %v1468_v31  ;;  %v1475_v45 = vadd.f32 %v1474_v37, %v1473_v11  ;;  %v3365_v5 = vmax.f32 %v3340_v3, %v1361_v2  ;;  %v1740_v48 = vadd.f32 %v1739_v28, %v1738_v56  ;;  %v1687_v11 = vpop.permute.xlu0 %1686 }
 0x370   : > { %v1760_v22 = vrot.slane %v1759_v34, 2  ;;  %v1746_v33 = vrot.slane %v1745_v55, 2  ;;  %2387 = vrcp.f32 %v1484_v1  ;;  %v1491_v17 = vadd.f32 %v1490_v62, %v1489_v25 }
 0x371   : > { %v1476_v29 = vrot.slane %v1475_v45, 1  ;;  %v1506_v49 = vsel %vm541_vm1, %v2382_v9, 0.0  ;;  %v1726_v50 = vmul.f32 %v2382_v9, %v1685_v36  ;;  %2389 = vrcp.f32 %v1470_v43 }
 0x372   : > { %v1507_v39 = vrot.slane %v1506_v49, 4  ;;  %v1492_v35 = vsel %vm541_vm1, %v2384_v18, 0.0  ;;  %v1724_v52 = vmul.f32 %v2384_v18, %v1681_v60  ;;  %v1513_v57 = vsel %vm541_vm1, %v2386_v10, 0.0 }
 0x373   : > { %v1477_v30 = vadd.f32 %v1476_v29, %v1475_v45  ;;  %v1778_v32 = vsel %vm541_vm1, %v1726_v50, 0.0  ;;  %v1493_v3 = vrot.slane %v1492_v35, 4  ;;  %v1747_v56 = vadd.f32 %v1746_v33, %v1745_v55 }
 0x374   : > { %v1508_v58 = vadd.f32 %v1507_v39, %v1506_v49  ;;  %v1779_v61 = vrot.slane %v1778_v32, 4  ;;  %v1764_v2 = vsel %vm541_vm1, %v1724_v52, 0.0  ;;  %v1514_v31 = vrot.slane %v1513_v57, 4 }
 0x375   : > { %2391 = vrcp.f32 %v1477_v30  ;;  %v1494_v0 = vadd.f32 %v1493_v3, %v1492_v35  ;;  %v1378_v36 = vmax.f32 %v1376_v63, %v1377_v21  ;;  %v1755_v14 = vrot.slane %v1754_v46, 1 }
 0x376   : > { %v1761_v16 = vadd.f32 %v1760_v22, %v1759_v34  ;;  %v1383_v9 = vmax.f32 %v3344_v7, %v1382_v41  ;;  %v1368_v12 = vrot.slane %v1367_v15, 4  ;;  %v1509_v27 = vrot.slane %v1508_v58, 2 }
 0x377   : > { %v1780_v25 = vadd.f32 %v1779_v61, %v1778_v32  ;;  %v1727_v60 = vmul.f32 %v2386_v10, %v1687_v11  ;;  %v1442_v18 = vmul.f32 1.442695, %v1421_v19  ;;  %v1741_v44 = vrot.slane %v1740_v48, 1 }
 0x378   : > { %2393 = vrcp.f32 %v1491_v17  ;;  %v1748_v28 = vrot.slane %v1747_v56, 1  ;;  %v1765_v37 = vrot.slane %v1764_v2, 4  ;;  %v1495_v53 = vrot.slane %v1494_v0, 2 }
 0x379   : > { %v1515_v1 = vadd.f32 %v1514_v31, %v1513_v57  ;;  %2395 = vpow2.f32 %v1442_v18  ;;  %v1379_v62 = vrot.slane %v1378_v36, 1  ;;  %v1762_v43 = vrot.slane %v1761_v16, 1 }
 0x37a   : > { %v1363_v63 = vrot.slane %v3365_v5, 2  ;;  %v2388_v34 = vpop.eup %2387  ;;  %v1510_v7 = vadd.f32 %v1509_v27, %v1508_v58  ;;  %v1781_v41 = vrot.slane %v1780_v25, 2  ;;  %v1785_v45 = vsel %vm541_vm1, %v1727_v60, 0.0 }
 0x37b   : > { %v1384_v10 = vrot.slane %v1383_v9, 2  ;;  %v2390_v55 = vpop.eup %2389  ;;  %v1756_v19 = vadd.f32 %v1755_v14, %v1754_v46  ;;  %v1742_v21 = vadd.f32 %v1741_v44, %v1740_v48  ;;  %v1766_v22 = vadd.f32 %v1765_v37, %v1764_v2 }
 0x37c   : > { %v1369_v29 = vmax.f32 %v1367_v15, %v1368_v12  ;;  %v1749_v33 = vadd.f32 %v1748_v28, %v1747_v56  ;;  %v1496_v17 = vadd.f32 %v1495_v53, %v1494_v0  ;;  %v1516_v49 = vrot.slane %v1515_v1, 2 }
 0x37d   : > { %v1380_v50 = vmax.f32 %v1378_v36, %v1379_v62  ;;  %v1866_v39 = vmul.f32 %v2388_v34, %v1756_v19  ;;  %v1763_v35 = vadd.f32 %v1762_v43, %v1761_v16  ;;  %v1786_v32 = vrot.slane %v1785_v45, 4 }
 0x37e   : > { %v1364_v3 = vmax.f32 %v3365_v5, %v1363_v63  ;;  %v1864_v52 = vmul.f32 %v2390_v55, %v1742_v21  ;;  %v1511_v58 = vrot.slane %v1510_v7, 1  ;;  %v3378_v61 = vadd.f32 %v1781_v41, %v1780_v25 }
 0x37f   : > { %v2392_v30 = vpop.eup %2391  ;;  %v1767_v31 = vrot.slane %v1766_v22, 2  ;;  %v1426_v46 = vsub.f32 %v3320_v54, %v1380_v50  ;;  %v1385_v15 = vmax.f32 %v1383_v9, %v1384_v10  ;;  %v1497_v0 = vrot.slane %v1496_v17, 1 }
 0x380   : > { %v1865_v57 = vmul.f32 %v2392_v30, %v1749_v33  ;;  %v1365_v48 = vrot.slane %v1364_v3, 1  ;;  %v3382_v2 = vadd.f32 %v1516_v49, %v1515_v1  ;;  %v1370_v36 = vrot.slane %v1369_v29, 2 }
 0x381   : > { %v1452_v5 = vmul.f32 1.442695, %v1426_v46  ;;  %v1386_v12 = vrot.slane %v1385_v15, 1  ;;  %v1787_v25 = vadd.f32 %v1786_v32, %v1785_v45  ;;  %v1402_v54 = vsel %vm541_vm1, %v3332_v24, -inf }
 0x382   : > { %v1897_v56 = vsel %vm1896_vm3, %v1865_v57, %v1864_v52  ;;  %v2394_v11 = vpop.eup %2393  ;;  %v1366_v16 = vmax.f32 %v1364_v3, %v1365_v48  ;;  %v1371_v60 = vmax.f32 %v1369_v29, %v1370_v36  ;;  %v1388_v9 = vsel %vm541_vm1, %v3334_v40, -inf }
 0x383   : > { %v3385_v14 = vsel %vm1898_vm4, %v1866_v39, %v1897_v56  ;;  %v2396_v27 = vpop.eup %2395  ;;  %2397 = vpow2.f32 %v1452_v5  ;;  %v1387_v53 = vmax.f32 %v1385_v15, %v1386_v12  ;;  %v1403_v62 = vrot.slane %v1402_v54, 4 }
 0x384   : > { %v1499_v18 = vsel %vm541_vm1, %v2396_v27, 0.0  ;;  %v1725_v44 = vmul.f32 %v2396_v27, %v3367_v51  ;;  %v1424_v28 = vsub.f32 %v3322_v38, %v1366_v16  ;;  %v1372_v1 = vrot.slane %v1371_v60, 1 }
 0x385   : > { %v1500_v37 = vrot.slane %v1499_v18, 4  ;;  %v3394_v43 = vmul.f32 %v2394_v11, %v1763_v35  ;;  %v1389_v34 = vrot.slane %v1388_v9, 4  ;;  %v1409_v41 = vsel %vm541_vm1, %v3346_v26, -inf }
 0x386   : > { %v1448_v63 = vmul.f32 1.442695, %v1424_v28  ;;  %v1771_v10 = vsel %vm541_vm1, %v1725_v44, 0.0  ;;  %v1427_v55 = vsub.f32 %v3324_v20, %v1387_v53  ;;  %v1373_v51 = vmax.f32 %v1371_v60, %v1372_v1 }
 0x387   : > { %v1501_v45 = vadd.f32 %v1500_v37, %v1499_v18  ;;  %v1404_v19 = vmax.f32 %v1402_v54, %v1403_v62  ;;  %v1390_v38 = vmax.f32 %v1388_v9, %v1389_v34  ;;  %v1410_v21 = vrot.slane %v1409_v41, 4 }
 0x388   : > { %2399 = vpow2.f32 %v1448_v63  ;;  %v1512_v29 = vadd.f32 %v1511_v58, %v1510_v7  ;;  %v1783_v33 = vrot.slane %v3378_v61, 1  ;;  %v1454_v50 = vmul.f32 1.442695, %v1427_v55 }
 0x389   : > { %v1502_v49 = vrot.slane %v1501_v45, 2  ;;  %v1768_v30 = vadd.f32 %v1767_v31, %v1766_v22  ;;  %v1425_v39 = vsub.f32 %v3326_v6, %v1373_v51  ;;  %v1405_v35 = vrot.slane %v1404_v19, 2 }
 0x38a   : > { %v1391_v32 = vrot.slane %v1390_v38, 2  ;;  %v1772_v52 = vrot.slane %v1771_v10, 4  ;;  %2401 = vpow2.f32 %v1454_v50  ;;  %v1411_v57 = vmax.f32 %v1409_v41, %v1410_v21 }
 0x38b   : > { %v1503_v3 = vadd.f32 %v1502_v49, %v1501_v45  ;;  %v1498_v20 = vadd.f32 %v1497_v0, %v1496_v17  ;;  %v1450_v46 = vmul.f32 1.442695, %v1425_v39  ;;  %v1406_v48 = vmax.f32 %v1404_v19, %v1405_v35 }
 0x38c   : > { %v1392_v15 = vmax.f32 %v1390_v38, %v1391_v32  ;;  %v1788_v56 = vrot.slane %v1787_v25, 2  ;;  %v1412_v7 = vrot.slane %v1411_v57, 2  ;;  %v1395_v58 = vsel %vm541_vm1, %v3350_v13, -inf }
 0x38d   : > { %v1504_v36 = vrot.slane %v1503_v3, 1  ;;  %v2398_v11 = vpop.eup %2397  ;;  %v1518_v22 = vrot.slane %v3382_v2, 1  ;;  %2403 = vpow2.f32 %v1450_v46  ;;  %v1407_v6 = vrot.slane %v1406_v48, 1 }
 0x38e   : > { %v1393_v31 = vrot.slane %v1392_v15, 1  ;;  %v3406_v5 = vadd.f32 %v1783_v33, %v3378_v61  ;;  %2405 = vrcp.f32 %v1512_v29  ;;  %v1773_v17 = vadd.f32 %v1772_v52, %v1771_v10 }
 0x38f   : > { %v1534_v0 = vsel %vm541_vm1, %v2398_v11, 0.0  ;;  %v1408_v12 = vmax.f32 %v1406_v48, %v1407_v6  ;;  %v1413_v27 = vmax.f32 %v1411_v57, %v1412_v7  ;;  %v1396_v60 = vrot.slane %v1395_v58, 4 }
 0x390   : > { %v1535_v16 = vrot.slane %v1534_v0, 4  ;;  %v1769_v54 = vrot.slane %v1768_v30, 1  ;;  %2407 = vrcp.f32 %v1498_v20  ;;  %v1789_v9 = vadd.f32 %v1788_v56, %v1787_v25 }
 0x391   : > { %v1505_v18 = vadd.f32 %v1504_v36, %v1503_v3  ;;  %v1519_v28 = vadd.f32 %v1518_v22, %v3382_v2  ;;  %v1430_v53 = vsub.f32 %v3332_v24, %v1408_v12  ;;  %v1394_v61 = vmax.f32 %v1392_v15, %v1393_v31 }
 0x392   : > { %v2400_v44 = vpop.eup %2399  ;;  %v1536_v37 = vadd.f32 %v1535_v16, %v1534_v0  ;;  %v1774_v1 = vrot.slane %v1773_v17, 2  ;;  %v1414_v34 = vrot.slane %v1413_v27, 1  ;;  %v1730_v41 = vmul.f32 %v2398_v11, %v3302_v59 }
 0x393   : > { %v1520_v62 = vsel %vm541_vm1, %v2400_v44, 0.0  ;;  %v1728_v63 = vmul.f32 %v2400_v44, %v3305_v8  ;;  %v1460_v10 = vmul.f32 1.442695, %v1430_v53  ;;  %v1397_v55 = vmax.f32 %v1395_v58, %v1396_v60 }
 0x394   : > { %v1521_v45 = vrot.slane %v1520_v62, 4  ;;  %v2402_v25 = vpop.eup %2401  ;;  %v1770_v51 = vadd.f32 %v1769_v54, %v1768_v30  ;;  %v1790_v19 = vrot.slane %v1789_v9, 1  ;;  %2409 = vrcp.f32 %v1505_v18 }
 0x395   : > { %v1537_v2 = vrot.slane %v1536_v37, 2  ;;  %2411 = vrcp.f32 %v1519_v28  ;;  %v1428_v38 = vsub.f32 %v3334_v40, %v1394_v61  ;;  %v1415_v21 = vmax.f32 %v1413_v27, %v1414_v34 }
 0x396   : > { %v1522_v24 = vadd.f32 %v1521_v45, %v1520_v62  ;;  %v1775_v29 = vadd.f32 %v1774_v1, %v1773_v17  ;;  %v1792_v8 = vsel %vm541_vm1, %v1728_v63, 0.0  ;;  %v1541_v33 = vsel %vm541_vm1, %v2402_v25, 0.0 }
 0x397   : > { %2413 = vpow2.f32 %v1460_v10  ;;  %v2404_v59 = vpop.eup %2403  ;;  %v1806_v49 = vsel %vm541_vm1, %v1730_v41, 0.0  ;;  %v1731_v30 = vmul.f32 %v2402_v25, %v3307_v4  ;;  %v1398_v39 = vrot.slane %v1397_v55, 2 }
 0x398   : > { %v1523_v50 = vrot.slane %v1522_v24, 2  ;;  %v2406_v35 = vpop.eup %2405  ;;  %v1538_v32 = vadd.f32 %v1537_v2, %v1536_v37  ;;  %v1542_v3 = vrot.slane %v1541_v33, 4  ;;  %v1527_v52 = vsel %vm541_vm1, %v2404_v59, 0.0 }
 0x399   : > { %v1729_v40 = vmul.f32 %v2404_v59, %v3318_v47  ;;  %v1793_v20 = vrot.slane %v1792_v8, 4  ;;  %v1456_v46 = vmul.f32 1.442695, %v1428_v38  ;;  %v1431_v48 = vsub.f32 %v3346_v26, %v1415_v21 }
 0x39a   : > { %v1524_v57 = vadd.f32 %v1523_v50, %v1522_v24  ;;  %v2408_v15 = vpop.eup %2407  ;;  %v1791_v56 = vadd.f32 %v1790_v19, %v1789_v9  ;;  %v1543_v36 = vadd.f32 %v1542_v3, %v1541_v33  ;;  %v1528_v7 = vrot.slane %v1527_v52, 4 }
 0x39b   : > { %v1799_v4 = vsel %vm541_vm1, %v1729_v40, 0.0  ;;  %v1776_v58 = vrot.slane %v1775_v29, 1  ;;  %v1807_v11 = vrot.slane %v1806_v49, 4  ;;  %v1813_v22 = vsel %vm541_vm1, %v1731_v30, 0.0 }
 0x39c   : > { %v1399_v6 = vmax.f32 %v1397_v55, %v1398_v39  ;;  %v1539_v47 = vrot.slane %v1538_v32, 1  ;;  %v1525_v31 = vrot.slane %v1524_v57, 1  ;;  %v1544_v17 = vrot.slane %v1543_v36, 2 }
 0x39d   : > { %v1529_v0 = vadd.f32 %v1528_v7, %v1527_v52  ;;  %v1794_v16 = vadd.f32 %v1793_v20, %v1792_v8  ;;  %v1800_v26 = vrot.slane %v1799_v4, 4  ;;  %2415 = vpow2.f32 %v1456_v46  ;;  %v1699_v20 = vpop.permute.xlu1 %1698 }
 0x39e   : > { %v1462_v12 = vmul.f32 1.442695, %v1431_v48  ;;  %v2410_v27 = vpop.eup %2409  ;;  %v1868_v60 = vmul.f32 %v2408_v15, %v1770_v51  ;;  %v1545_v54 = vadd.f32 %v1544_v17, %v1543_v36  ;;  %v1814_v9 = vrot.slane %v1813_v22, 4 }
 0x39f   : > { %v1530_v18 = vrot.slane %v1529_v0, 2  ;;  %v2412_v44 = vpop.eup %2411  ;;  %v1777_v28 = vadd.f32 %v1776_v58, %v1775_v29  ;;  %v1801_v37 = vadd.f32 %v1800_v26, %v1799_v4  ;;  %v1400_v53 = vrot.slane %v1399_v6, 1 }
 0x3a0   : > { %v1901_v61 = vsel %vm1900_vm5, %v3394_v43, %v3385_v14  ;;  %v1808_v62 = vadd.f32 %v1807_v11, %v1806_v49  ;;  %v1526_v63 = vadd.f32 %v1525_v31, %v1524_v57  ;;  %v1546_v34 = vrot.slane %v1545_v54, 1 }
 0x3a1   : > { %v2414_v1 = vpop.eup %2413  ;;  %v1531_v41 = vadd.f32 %v1530_v18, %v1529_v0  ;;  %v1869_v45 = vmul.f32 %v2410_v27, %v1777_v28  ;;  %v1540_v10 = vadd.f32 %v1539_v47, %v1538_v32  ;;  %v1795_v55 = vrot.slane %v1794_v16, 2 }
 0x3a2   : > { %2417 = vpow2.f32 %v1462_v12  ;;  %v1870_v25 = vmul.f32 %v2406_v35, %v3406_v5  ;;  %v1815_v51 = vadd.f32 %v1814_v9, %v1813_v22  ;;  %v1802_v2 = vrot.slane %v1801_v37, 2  ;;  %v1703_v9 = vpop.permute.xlu1 %1702 }
 0x3a3   : > { %v1532_v19 = vrot.slane %v1531_v41, 1  ;;  %v1547_v24 = vadd.f32 %v1546_v34, %v1545_v54  ;;  %v1562_v38 = vsel %vm541_vm1, %v2414_v1, 0.0  ;;  %v1401_v21 = vmax.f32 %v1399_v6, %v1400_v53 }
 0x3a4   : > { %v1903_v14 = vsel %vm1902_vm6, %v1868_v60, %v1901_v61  ;;  %v1871_v43 = vmul.f32 %v2412_v44, %v1791_v56  ;;  %v1809_v29 = vrot.slane %v1808_v62, 2  ;;  %2419 = vrcp.f32 %v1526_v63 }
 0x3a5   : > { %v1533_v8 = vadd.f32 %v1532_v19, %v1531_v41  ;;  %2421 = vrcp.f32 %v1540_v10  ;;  %v1796_v33 = vadd.f32 %v1795_v55, %v1794_v16  ;;  %v1429_v59 = vsub.f32 %v3350_v13, %v1401_v21 }
 0x3a6   : > { %v1905_v5 = vsel %vm1904_vm7, %v1869_v45, %v1903_v14  ;;  %v1816_v49 = vrot.slane %v1815_v51, 2  ;;  %v1563_v50 = vrot.slane %v1562_v38, 4  ;;  %v1803_v35 = vadd.f32 %v1802_v2, %v1801_v37 }
 0x3a7   : > { %2423 = vrcp.f32 %v1533_v8  ;;  %v1907_v30 = vsel %vm1906_vm8, %v1870_v25, %v1905_v5  ;;  %v2416_v39 = vpop.eup %2415  ;;  %v1458_v32 = vmul.f32 1.442695, %v1429_v59  ;;  %v1810_v52 = vadd.f32 %v1809_v29, %v1808_v62 }
 0x3a8   : > { %2425 = vrcp.f32 %v1547_v24  ;;  %v1909_v3 = vsel %vm1908_vm9, %v1871_v43, %v1907_v30  ;;  %v1548_v40 = vsel %vm541_vm1, %v2416_v39, 0.0  ;;  %v1732_v57 = vmul.f32 %v2416_v39, %v3336_v42 }
 0x3a9   : > { %1919 = vst.msk [vmem:[%s3437_s21] sm:$0xff] %vm541_vm1, %v1909_v3  ;;  %v1549_v13 = vrot.slane %v1548_v40, 4  ;;  %2427 = vpow2.f32 %v1458_v32  ;;  %v1797_v46 = vrot.slane %v1796_v33, 1  ;;  %v1817_v48 = vadd.f32 %v1816_v49, %v1815_v51 }
 0x3aa   : > { %v1820_v15 = vsel %vm541_vm1, %v1732_v57, 0.0  ;;  %v1804_v36 = vrot.slane %v1803_v35, 1  ;;  %v1564_v7 = vadd.f32 %v1563_v50, %v1562_v38  ;;  %v1811_v11 = vrot.slane %v1810_v52, 1 }
 0x3ab   : > { %v1550_v4 = vadd.f32 %v1549_v13, %v1548_v40  ;;  %v1821_v58 = vrot.slane %v1820_v15, 4  ;;  %v1798_v31 = vadd.f32 %v1797_v46, %v1796_v33  ;;  %v1818_v17 = vrot.slane %v1817_v48, 1 }
 0x3ac   : > { %v2418_v56 = vpop.eup %2417  ;;  %v1805_v26 = vadd.f32 %v1804_v36, %v1803_v35  ;;  %v1565_v12 = vrot.slane %v1564_v7, 2  ;;  %v1734_v27 = vmul.f32 %v2414_v1, %v3328_v23  ;;  %v1812_v18 = vadd.f32 %v1811_v11, %v1810_v52 }
 0x3ad   : > { %v1569_v42 = vsel %vm541_vm1, %v2418_v56, 0.0  ;;  %v1551_v22 = vrot.slane %v1550_v4, 2  ;;  %v1822_v0 = vadd.f32 %v1821_v58, %v1820_v15  ;;  %v1735_v62 = vmul.f32 %v2418_v56, %v1703_v9 }
 0x3ae   : > { %v1570_v6 = vrot.slane %v1569_v42, 4  ;;  %v2420_v47 = vpop.eup %2419  ;;  %v1819_v34 = vadd.f32 %v1818_v17, %v1817_v48  ;;  %v1566_v25 = vadd.f32 %v1565_v12, %v1564_v7  ;;  %v1834_v23 = vsel %vm541_vm1, %v1734_v27, 0.0 }
 0x3af   : > { %v2422_v16 = vpop.eup %2421  ;;  %v1552_v60 = vadd.f32 %v1551_v22, %v1550_v4  ;;  %v1872_v37 = vmul.f32 %v2420_v47, %v1798_v31  ;;  %v1823_v41 = vrot.slane %v1822_v0, 2  ;;  %v1841_v38 = vsel %vm541_vm1, %v1735_v62, 0.0 }
 0x3b0   : > { %v1571_v44 = vadd.f32 %v1570_v6, %v1569_v42  ;;  %v1874_v63 = vmul.f32 %v2422_v16, %v1812_v18  ;;  %v1567_v8 = vrot.slane %v1566_v25, 1  ;;  %v1835_v33 = vrot.slane %v1834_v23, 4 }
 0x3b1   : > { %v2424_v54 = vpop.eup %2423  ;;  %v1553_v61 = vrot.slane %v1552_v60, 1  ;;  %v1824_v43 = vadd.f32 %v1823_v41, %v1822_v0  ;;  %v1842_v50 = vrot.slane %v1841_v38, 4 }
 0x3b2   : > { %v2426_v28 = vpop.eup %2425  ;;  %v1873_v53 = vmul.f32 %v2424_v54, %v1805_v26  ;;  %v1572_v45 = vrot.slane %v1571_v44, 2  ;;  %v1568_v3 = vadd.f32 %v1567_v8, %v1566_v25  ;;  %v1836_v52 = vadd.f32 %v1835_v33, %v1834_v23 }
 0x3b3   : > { %v2428_v10 = vpop.eup %2427  ;;  %v1554_v1 = vadd.f32 %v1553_v61, %v1552_v60  ;;  %v1875_v51 = vmul.f32 %v2426_v28, %v1819_v34  ;;  %v1825_v35 = vrot.slane %v1824_v43, 1  ;;  %v1843_v13 = vadd.f32 %v1842_v50, %v1841_v38 }
 0x3b4   : > { %v1910_v55 = vsel %vm1896_vm3, %v1873_v53, %v1872_v37  ;;  %v1573_v2 = vadd.f32 %v1572_v45, %v1571_v44  ;;  %v1555_v24 = vsel %vm541_vm1, %v2428_v10, 0.0  ;;  %v1733_v14 = vmul.f32 %v2428_v10, %v1699_v20 }
 0x3b5   : > { %v1911_v19 = vsel %vm1898_vm4, %v1874_v63, %v1910_v55  ;;  %2429 = vrcp.f32 %v1554_v1  ;;  %v1556_v21 = vrot.slane %v1555_v24, 4  ;;  %v1826_v46 = vadd.f32 %v1825_v35, %v1824_v43 }
 0x3b6   : > { %v1912_v29 = vsel %vm1900_vm5, %v1875_v51, %v1911_v19  ;;  %v1827_v5 = vsel %vm541_vm1, %v1733_v14, 0.0  ;;  %v1574_v49 = vrot.slane %v1573_v2, 1  ;;  %v1837_v56 = vrot.slane %v1836_v52, 2 }
 0x3b7   : > { %v1557_v59 = vadd.f32 %v1556_v21, %v1555_v24  ;;  %v1828_v30 = vrot.slane %v1827_v5, 4  ;;  %2431 = vrcp.f32 %v1568_v3  ;;  %v1844_v4 = vrot.slane %v1843_v13, 2 }
 0x3b8   : > { %v1575_v57 = vadd.f32 %v1574_v49, %v1573_v2  ;;  %v1838_v42 = vadd.f32 %v1837_v56, %v1836_v52 }
 0x3b9   : > { %v1558_v39 = vrot.slane %v1557_v59, 2  ;;  %v1829_v32 = vadd.f32 %v1828_v30, %v1827_v5  ;;  %v1845_v22 = vadd.f32 %v1844_v4, %v1843_v13 }
 0x3ba   : > { %2433 = vrcp.f32 %v1575_v57  ;;  %v1839_v47 = vrot.slane %v1838_v42, 1 }
 0x3bb   : > { %v1559_v40 = vadd.f32 %v1558_v39, %v1557_v59  ;;  %v1830_v48 = vrot.slane %v1829_v32, 2  ;;  %v1846_v31 = vrot.slane %v1845_v22, 1 }
 0x3bc   : > { %v1840_v12 = vadd.f32 %v1839_v47, %v1838_v42 }
 0x3bd   : > { %v1560_v20 = vrot.slane %v1559_v40, 1  ;;  %v1831_v58 = vadd.f32 %v1830_v48, %v1829_v32  ;;  %v1847_v27 = vadd.f32 %v1846_v31, %v1845_v22 }
 0x3bf   : > { %v2430_v15 = vpop.eup %2429  ;;  %v1561_v36 = vadd.f32 %v1560_v20, %v1559_v40  ;;  %v1832_v6 = vrot.slane %v1831_v58, 1 }
 0x3c0   : > { %v1876_v7 = vmul.f32 %v2430_v15, %v1826_v46 }
 0x3c1   : > { %2435 = vrcp.f32 %v1561_v36  ;;  %v2432_v17 = vpop.eup %2431  ;;  %v1833_v16 = vadd.f32 %v1832_v6, %v1831_v58 }
 0x3c2   : > { %v1913_v11 = vsel %vm1902_vm6, %v1876_v7, %v1912_v29  ;;  %v1878_v54 = vmul.f32 %v2432_v17, %v1840_v12 }
 0x3c4   : > { %v2434_v0 = vpop.eup %2433 }
 0x3c5   : > { %v1879_v9 = vmul.f32 %v2434_v0, %v1847_v27 }
 0x3cb   : > { %v2436_v26 = vpop.eup %2435 }
 0x3cc   : > { %v1877_v60 = vmul.f32 %v2436_v26, %v1833_v16 }
 0x3ce   : > { %v1914_v18 = vsel %vm1904_vm7, %v1877_v60, %v1913_v11 }
 0x3cf   : > { %v1915_v44 = vsel %vm1906_vm8, %v1878_v54, %v1914_v18 }
 0x3d0   : > { %v1916_v28 = vsel %vm1908_vm9, %v1879_v9, %v1915_v44 }
 0x3d1   : > { %1920 = vst.msk [vmem:[%s3437_s21 + $0x8] sm:$0xff] %vm541_vm1, %v1916_v28 }
 0x3d2   : > { %2566 = shalt.err (!%p2563_p11)
}
 0x3d3   : > { %s2567_s18 = scalar_lea.hbm %s3458_s23, 256  ;;  %s2571_s25 = scalar_lea.hbm %s3555_s4, 512 }
 0x3d4   : > { %p2568_p2 = scmp.ne.s32.totalorder %s3458_s23, %s2567_s18  ;;  %p2572_p13 = scmp.lt.u32.totalorder %s3458_s23, %s3555_s4 }
 0x3d5   : > { %p2573_p0 = scmp.lt.u32.totalorder %s2571_s25, %s2567_s18  ;;  %p2575_p6 = scmp.lt.u32.totalorder %s2567_s18, %s3458_s23 }
 0x3d6   : > { %p2569_p8 = pnand %p2568_p2, %p3556_p10 }
 0x3d7   : > { %p2574_p1 = por %p2573_p0, %p2572_p13 }
 0x3d8   : > { %p2570_p12 = pneg %p2569_p8 }
 0x3d9   : > { %p2576_p3 = por %p2575_p6, %p2574_p1 }
 0x3db   : > { %p2577_p4 = pnand %p2576_p3, %p2570_p12 }
 0x3dd   : > { %2580 = shalt.err (!%p2577_p4)
}
 0x3de   : > { %s2663_s15 = smov 128   ;;  %s2664_s21 = smov 8  }
 0x3df   : > { %2276 = dma.vmem_to_hbm [thread:$0]  (%p3556_p10), %s3460_s5, 256, %s3458_s23, %s1922_s12, %s2663_s15, %s2663_s15, %s2664_s21  }
 0x3e0 PF: > { %s3557_s29 = sld [smem:[#allocation16_spill]]  ;;  %s3558_s24 = sld [smem:[#allocation17_spill]] }
 0x3e1   : > { %p3560_p5 = scmp.ge.s32.totalorder %s2647_s14, 2 }
 0x3e6   : > { %s1952_s16 = sand.u32 1, %s3557_s29   ;;  %p3559_p9 = scmp.ne.s32.totalorder %s3558_s24, 0 }
 0x3e7   : > { %s1953_s9 = scalar_lea.sflag [#allocation4], %s1952_s16 }
 0x3e8   : > { %p2293_p7 = pnand %p3560_p5, %p3559_p9 }
 0x3ea   : > { %2622 = dma.done.wait (!%p2293_p7), %s1953_s9, 256  }
 0x3eb   : > { %2624 = vsyncadd (!%p2293_p7), %s1953_s9, 4294967040  ;;  %s29_s14 = sadd.s32 1, %s2647_s14   ;;  %s3561_s27 = sld [smem:[#allocation19_spill]] }
 0x3ec   : > { %p26_p11 = scmp.ge.s32.totalorder %s29_s14, 4   ;;  %s3562_s22 = sld [smem:[#allocation18_spill]] }
 0x3ed   : > { %s3563_s30 = smov %s2631_s10  ;;  %s3564_s10 = smov %s2635_s11 }
 0x3ee   : > { %s3566_s12 = smov %s2643_s13  ;;  %28 = sbr.rel (!%p26_p11) target bundleno = 14 (0xe), region = 125 }
 0x3f1   : > { %s3565_s11 = smov %s3561_s27 }
 0x3f2   : > { %s3567_s13 = smov %s3562_s22 }
 0x3f5   :  { %1958 = vsyncpa [#allocation3], 1 }
 0x3f6   :  { %1960 = vsyncpa [#allocation3 + $0x1], 1 }
 0x3f7   :  { %1961 = vsyncpa [#allocation6], 1 }
 0x3f8   :  { %1963 = vsyncpa [#allocation6 + $0x1], 1 }
 0x3f9   :  { %1964 = vsyncpa [#allocation9], 1 }
 0x3fa   :  { %1965 = vsyncpa [#allocation4], 1 }
 0x3fb   :  { %1967 = vsyncpa [#allocation4 + $0x1], 1 }

</bundles_post_ra>
